<compile_context>
chip_gen: v6e
topology: v6e:2x2x1
jax: 0.10.0
libtpu: 0.0.40
codegen_flags: <defaults>
</compile_context>

<pallas_src>
import math
import jax
import jax.numpy as jnp
from jax.experimental import pallas as pl
from jax.experimental.pallas import tpu as pltpu

# ---- small, module-consistent configuration ----
B = 2                        # batch_size
T = 8                        # n_of_frames (sequence length)
C, IMG_H, IMG_W = 4, 8, 8    # per-frame image
IN_FLAT = C * IMG_H * IMG_W  # flattened frame features fed to the input block
D_MODEL = 32                 # input_feature_dim == d_model -> input_proj is Identity
NHEAD = 4
HEAD_DIM = D_MODEL // NHEAD
DIM_FF = 64
NUM_LAYERS = 2
LN_EPS = 1e-5
MXU_DTYPE = jnp.bfloat16     # matmul-operand dtype (f32 accumulation kept)


def _vmem_spec():
    return pl.BlockSpec(memory_space=pltpu.MemorySpace.VMEM)


# ---------------------------------------------------------------------------
# Fully fused kernel: input block + positional encoding + NUM_LAYERS encoder
# layers (post-norm, ReLU FFN), eval-mode semantics of
# nn.TransformerEncoder(TransformerEncoderLayer(..., batch_first=False)).
# (B, S, D) layout is equivalent to PyTorch's (S, B, D): attention only mixes
# along the sequence axis per batch element.
# ---------------------------------------------------------------------------
def fused_forward_kernel(x_ref, w_in_ref, b_in_ref, pe_ref,
                         wqkv_ref, wo_ref, w1_ref, w2_ref, bias_ref,
                         o_ref):
    bt, _ = x_ref.shape               # (B*T, IN_FLAT)
    t, d = pe_ref.shape               # (T, D)
    b = bt // t
    nh = NHEAD
    hd = d // nh

    def mm(a, w):
        # bf16 MXU operands, f32 accumulation
        return jnp.dot(a.astype(w.dtype), w, preferred_element_type=jnp.float32)

    def layer_norm(x2, g, bb):
        mu = jnp.mean(x2, axis=-1, keepdims=True)
        ms = jnp.mean(x2 * x2, axis=-1, keepdims=True)
        var = jnp.maximum(ms - mu * mu, 0.0)      # single-pass (biased) variance
        return (x2 - mu) * jax.lax.rsqrt(var + LN_EPS) * g + bb

    # ---- TimeDistributed input block: Flatten -> Linear -> ReLU ----
    h = jnp.maximum(mm(x_ref[...], w_in_ref[...]) + b_in_ref[...], 0.0)   # (BT, D)
    # ---- input_proj = Identity (d_model == input_feature_dim) ----
    # ---- positional encoding (broadcast over batch; pos dropout = identity) ----
    h = (h.reshape(b, t, d) + pe_ref[...][None, :, :]).reshape(bt, d)

    # ---- stacked encoder layers (all weights already resident in VMEM) ----
    for l in range(NUM_LAYERS):
        wqkv = wqkv_ref[l]          # (D, 3D)  bf16, 1/sqrt(hd) pre-folded into Q cols
        wo_h = wo_ref[l]            # (NHEAD, HEAD_DIM, D) bf16 (out_proj rows, per head)
        w1 = w1_ref[l]              # (D, F)    bf16
        w2 = w2_ref[l]              # (F, D)    bf16
        bias = bias_ref[l]          # (8, 3D)   f32 packed: bqkv,bo,b1,b2,g1,be1,g2,be2
        bqkv = bias[0:1, :]
        bo = bias[1:2, :d]
        b1 = bias[2:3, :DIM_FF]
        b2 = bias[3:4, :d]
        g1, be1 = bias[4:5, :d], bias[5:6, :d]
        g2, be2 = bias[6:7, :d], bias[7:8, :d]

        # --- multi-head self attention (fused QKV projection) ---
        qkv = mm(h, wqkv) + bqkv                        # (BT, 3D)
        qkv3 = qkv.reshape(b, t, 3 * d)

        attn = jnp.zeros((bt, d), jnp.float32)
        for hh in range(nh):                            # static unroll over heads
            qh = qkv3[:, :, hh * hd:(hh + 1) * hd]      # already scaled by 1/sqrt(hd)
            kh = qkv3[:, :, d + hh * hd:d + (hh + 1) * hd]
            vh = qkv3[:, :, 2 * d + hh * hd:2 * d + (hh + 1) * hd]
            s = jnp.einsum('bqd,bkd->bqk', qh, kh,
                           preferred_element_type=jnp.float32)
            s = s - jnp.max(s, axis=-1, keepdims=True)
            p = jnp.exp(s)
            p = p * pl.reciprocal(jnp.sum(p, axis=-1, keepdims=True), approx=True)
            ctx = jnp.einsum('bqk,bkd->bqd', p, vh,
                             preferred_element_type=jnp.float32)      # (B, T, HD)
            # fold out_proj into the head loop (no concat relayout)
            attn = attn + mm(ctx.reshape(bt, hd), wo_h[hh])
        attn = attn + bo

        h = layer_norm(h + attn, g1, be1)               # norm1 (post-norm)

        # --- feed-forward ---
        ff = jnp.maximum(mm(h, w1) + b1, 0.0)           # ReLU
        ff = mm(ff, w2) + b2
        h = layer_norm(h + ff, g2, be2)                 # norm2

    o_ref[...] = h.reshape(b, t, d)


# ---------------------------------------------------------------------------
# Parameter setup (deterministic, synthetic) + positional encoding table.
# Weights are stored in (in_dim, out_dim) orientation (PyTorch W^T).
# ---------------------------------------------------------------------------
def positional_encoding(max_len, d_model):
    pos = jnp.arange(max_len, dtype=jnp.float32)[:, None]
    div = jnp.exp(jnp.arange(0, d_model, 2, dtype=jnp.float32)
                  * (-math.log(10000.0) / d_model))
    pe = jnp.zeros((max_len, d_model), jnp.float32)
    pe = pe.at[:, 0::2].set(jnp.sin(pos * div))
    pe = pe.at[:, 1::2].set(jnp.cos(pos * div))      # d_model is even
    return pe


def _pad_row(v, width):
    return jnp.pad(v, (0, width - v.shape[0]))


def init_params(key):
    std = 0.02
    scale = 1.0 / math.sqrt(HEAD_DIM)
    keys = jax.random.split(key, 1 + NUM_LAYERS)
    w_in = std * jax.random.normal(keys[0], (IN_FLAT, D_MODEL), jnp.float32)
    b_in = jnp.zeros((1, D_MODEL), jnp.float32)

    wqkv_l, wo_l, w1_l, w2_l, bias_l = [], [], [], [], []
    width = 3 * D_MODEL
    for l in range(NUM_LAYERS):
        lk = jax.random.split(keys[1 + l], 6)
        wq = std * jax.random.normal(lk[0], (D_MODEL, D_MODEL), jnp.float32)
        wk = std * jax.random.normal(lk[1], (D_MODEL, D_MODEL), jnp.float32)
        wv = std * jax.random.normal(lk[2], (D_MODEL, D_MODEL), jnp.float32)
        wo = std * jax.random.normal(lk[3], (D_MODEL, D_MODEL), jnp.float32)
        w1 = std * jax.random.normal(lk[4], (D_MODEL, DIM_FF), jnp.float32)
        w2 = std * jax.random.normal(lk[5], (DIM_FF, D_MODEL), jnp.float32)
        bq = jnp.zeros((D_MODEL,), jnp.float32)
        bk = jnp.zeros((D_MODEL,), jnp.float32)
        bv = jnp.zeros((D_MODEL,), jnp.float32)
        # Fold attention scaling 1/sqrt(head_dim) into Q weights & bias (free,
        # removes an in-kernel VPU multiply per head per layer).
        wqkv_l.append(jnp.concatenate([wq * scale, wk, wv], axis=1))    # (D, 3D)
        wo_l.append(wo.reshape(NHEAD, HEAD_DIM, D_MODEL))               # head-split rows
        w1_l.append(w1)
        w2_l.append(w2)
        zD = jnp.zeros((D_MODEL,), jnp.float32)
        oD = jnp.ones((D_MODEL,), jnp.float32)
        rows = [jnp.concatenate([bq * scale, bk, bv]),   # qkv bias (Q part scaled)
                zD,                                      # out_proj bias
                jnp.zeros((DIM_FF,), jnp.float32),       # linear1 bias
                zD,                                      # linear2 bias
                oD, zD,                                  # norm1 gamma / beta
                oD, zD]                                  # norm2 gamma / beta
        bias_l.append(jnp.stack([_pad_row(r, width) for r in rows]))    # (8, 3D)

    return {
        'w_in': w_in.astype(MXU_DTYPE),
        'b_in': b_in,
        'pe': positional_encoding(T + 1, D_MODEL)[:T],                  # (T, D)
        'wqkv': jnp.stack(wqkv_l).astype(MXU_DTYPE),                    # (L, D, 3D)
        'wo': jnp.stack(wo_l).astype(MXU_DTYPE),                        # (L, H, HD, D)
        'w1': jnp.stack(w1_l).astype(MXU_DTYPE),                        # (L, D, F)
        'w2': jnp.stack(w2_l).astype(MXU_DTYPE),                        # (L, F, D)
        'bias': jnp.stack(bias_l),                                      # (L, 8, 3D) f32
    }


# ---------------------------------------------------------------------------
# Full forward pass (mirrors PyTorchTransformerEncoderBlock.forward) — one
# pallas_call for the entire block.
# ---------------------------------------------------------------------------
def forward(x, params):
    bsz, steps = x.shape[0], x.shape[1]
    x_flat = x.reshape(bsz * steps, -1).astype(jnp.float32)   # TimeDistributed fold
    return pl.pallas_call(
        fused_forward_kernel,
        out_shape=jax.ShapeDtypeStruct((bsz, steps, D_MODEL), jnp.float32),
        in_specs=[_vmem_spec()] * 9,
        out_specs=_vmem_spec(),
    )(x_flat, params['w_in'], params['b_in'], params['pe'],
      params['wqkv'], params['wo'], params['w1'], params['w2'], params['bias'])


if __name__ == "__main__":
    key = jax.random.PRNGKey(0)
    kx, kp = jax.random.split(key)
    x = jax.random.normal(kx, (B, T, C, IMG_H, IMG_W), jnp.float32)
    params = init_params(kp)

    out = jax.jit(forward)(x, params)
    out = jax.block_until_ready(out)

    assert out.shape == (B, T, D_MODEL), out.shape
    assert bool(jnp.all(jnp.isfinite(out)))
    print("KERNEL_OK")
</pallas_src>

<mosaic_0001>
module attributes {stable_mosaic.version = 11 : i64} {
  func.func @fused_forward_kernel(%arg0: memref<16x256xf32, #tpu.memory_space<vmem>>, %arg1: memref<256x32xbf16, #tpu.memory_space<vmem>>, %arg2: memref<1x32xf32, #tpu.memory_space<vmem>>, %arg3: memref<8x32xf32, #tpu.memory_space<vmem>>, %arg4: memref<2x32x96xbf16, #tpu.memory_space<vmem>>, %arg5: memref<2x4x8x32xbf16, #tpu.memory_space<vmem>>, %arg6: memref<2x32x64xbf16, #tpu.memory_space<vmem>>, %arg7: memref<2x64x32xbf16, #tpu.memory_space<vmem>>, %arg8: memref<2x8x96xf32, #tpu.memory_space<vmem>>, %arg9: memref<2x8x32xf32, #tpu.memory_space<vmem>>) attributes {dimension_semantics = [], scalar_prefetch = 0 : i64, scratch_operands = 0 : i64, tpu.core_type = #tpu.core_type<tc>} {
    %c0 = arith.constant 0 : index
    %c0_0 = arith.constant 0 : index
    %0 = vector.load %arg0[%c0, %c0_0] : memref<16x256xf32, #tpu.memory_space<vmem>>, vector<16x256xf32>
    %c0_1 = arith.constant 0 : index
    %c0_2 = arith.constant 0 : index
    %1 = vector.load %arg1[%c0_1, %c0_2] : memref<256x32xbf16, #tpu.memory_space<vmem>>, vector<256x32xbf16>
    %2 = arith.truncf %0 : vector<16x256xf32> to vector<16x256xbf16>
    %cst = arith.constant dense<0.000000e+00> : vector<16x32xf32>
    %3 = tpu.matmul %2, %1, %cst {dimension_numbers = #tpu.dot_dimension_numbers<[1], [0], [0], [1], [0, 0, 1, 1], [], []>} : vector<16x256xbf16>, vector<256x32xbf16>, vector<16x32xf32> -> vector<16x32xf32>
    %c0_3 = arith.constant 0 : index
    %c0_4 = arith.constant 0 : index
    %4 = vector.load %arg2[%c0_3, %c0_4] : memref<1x32xf32, #tpu.memory_space<vmem>>, vector<1x32xf32>
    %5 = vector.broadcast %4 : vector<1x32xf32> to vector<16x32xf32>
    %6 = arith.addf %3, %5 : vector<16x32xf32>
    %cst_5 = arith.constant 0.000000e+00 : f32
    %7 = vector.broadcast %cst_5 : f32 to vector<16x32xf32>
    %8 = arith.maximumf %6, %7 : vector<16x32xf32>
    %9 = vector.shape_cast %8 : vector<16x32xf32> to vector<2x8x32xf32>
    %c0_6 = arith.constant 0 : index
    %c0_7 = arith.constant 0 : index
    %10 = vector.load %arg3[%c0_6, %c0_7] : memref<8x32xf32, #tpu.memory_space<vmem>>, vector<8x32xf32>
    %11 = vector.shape_cast %10 : vector<8x32xf32> to vector<1x8x32xf32>
    %12 = vector.broadcast %11 : vector<1x8x32xf32> to vector<2x8x32xf32>
    %13 = arith.addf %9, %12 : vector<2x8x32xf32>
    %14 = vector.shape_cast %13 : vector<2x8x32xf32> to vector<16x32xf32>
    %c0_8 = arith.constant 0 : index
    %c0_9 = arith.constant 0 : index
    %c0_10 = arith.constant 0 : index
    %15 = vector.load %arg4[%c0_8, %c0_9, %c0_10] : memref<2x32x96xbf16, #tpu.memory_space<vmem>>, vector<1x32x96xbf16>
    %16 = vector.shape_cast %15 : vector<1x32x96xbf16> to vector<32x96xbf16>
    %c0_11 = arith.constant 0 : index
    %c0_12 = arith.constant 0 : index
    %c0_13 = arith.constant 0 : index
    %c0_14 = arith.constant 0 : index
    %17 = vector.load %arg5[%c0_11, %c0_12, %c0_13, %c0_14] : memref<2x4x8x32xbf16, #tpu.memory_space<vmem>>, vector<1x4x8x32xbf16>
    %18 = vector.shape_cast %17 : vector<1x4x8x32xbf16> to vector<4x8x32xbf16>
    %c0_15 = arith.constant 0 : index
    %c0_16 = arith.constant 0 : index
    %c0_17 = arith.constant 0 : index
    %19 = vector.load %arg6[%c0_15, %c0_16, %c0_17] : memref<2x32x64xbf16, #tpu.memory_space<vmem>>, vector<1x32x64xbf16>
    %20 = vector.shape_cast %19 : vector<1x32x64xbf16> to vector<32x64xbf16>
    %c0_18 = arith.constant 0 : index
    %c0_19 = arith.constant 0 : index
    %c0_20 = arith.constant 0 : index
    %21 = vector.load %arg7[%c0_18, %c0_19, %c0_20] : memref<2x64x32xbf16, #tpu.memory_space<vmem>>, vector<1x64x32xbf16>
    %22 = vector.shape_cast %21 : vector<1x64x32xbf16> to vector<64x32xbf16>
    %c0_21 = arith.constant 0 : index
    %c0_22 = arith.constant 0 : index
    %c0_23 = arith.constant 0 : index
    %23 = vector.load %arg8[%c0_21, %c0_22, %c0_23] : memref<2x8x96xf32, #tpu.memory_space<vmem>>, vector<1x8x96xf32>
    %24 = vector.shape_cast %23 : vector<1x8x96xf32> to vector<8x96xf32>
    %25 = vector.extract_strided_slice %24 {offsets = [0, 0], sizes = [1, 96], strides = [1, 1]} : vector<8x96xf32> to vector<1x96xf32>
    %26 = vector.extract_strided_slice %24 {offsets = [1, 0], sizes = [1, 32], strides = [1, 1]} : vector<8x96xf32> to vector<1x32xf32>
    %27 = vector.extract_strided_slice %24 {offsets = [2, 0], sizes = [1, 64], strides = [1, 1]} : vector<8x96xf32> to vector<1x64xf32>
    %28 = vector.extract_strided_slice %24 {offsets = [3, 0], sizes = [1, 32], strides = [1, 1]} : vector<8x96xf32> to vector<1x32xf32>
    %29 = vector.extract_strided_slice %24 {offsets = [4, 0], sizes = [1, 32], strides = [1, 1]} : vector<8x96xf32> to vector<1x32xf32>
    %30 = vector.extract_strided_slice %24 {offsets = [5, 0], sizes = [1, 32], strides = [1, 1]} : vector<8x96xf32> to vector<1x32xf32>
    %31 = vector.extract_strided_slice %24 {offsets = [6, 0], sizes = [1, 32], strides = [1, 1]} : vector<8x96xf32> to vector<1x32xf32>
    %32 = vector.extract_strided_slice %24 {offsets = [7, 0], sizes = [1, 32], strides = [1, 1]} : vector<8x96xf32> to vector<1x32xf32>
    %33 = arith.truncf %14 : vector<16x32xf32> to vector<16x32xbf16>
    %cst_24 = arith.constant dense<0.000000e+00> : vector<16x96xf32>
    %34 = tpu.matmul %33, %16, %cst_24 {dimension_numbers = #tpu.dot_dimension_numbers<[1], [0], [0], [1], [0, 0, 1, 1], [], []>} : vector<16x32xbf16>, vector<32x96xbf16>, vector<16x96xf32> -> vector<16x96xf32>
    %35 = vector.broadcast %25 : vector<1x96xf32> to vector<16x96xf32>
    %36 = arith.addf %34, %35 : vector<16x96xf32>
    %37 = vector.shape_cast %36 : vector<16x96xf32> to vector<2x8x96xf32>
    %cst_25 = arith.constant 0.000000e+00 : f32
    %38 = vector.broadcast %cst_25 : f32 to vector<16x32xf32>
    %39 = vector.extract_strided_slice %37 {offsets = [0, 0, 0], sizes = [2, 8, 8], strides = [1, 1, 1]} : vector<2x8x96xf32> to vector<2x8x8xf32>
    %40 = vector.extract_strided_slice %37 {offsets = [0, 0, 32], sizes = [2, 8, 8], strides = [1, 1, 1]} : vector<2x8x96xf32> to vector<2x8x8xf32>
    %41 = vector.extract_strided_slice %37 {offsets = [0, 0, 64], sizes = [2, 8, 8], strides = [1, 1, 1]} : vector<2x8x96xf32> to vector<2x8x8xf32>
    "tpu.trace_start"() <{level = 10 : i32, message = "bqd,bkd->bqk"}> : () -> ()
    %cst_26 = arith.constant dense<0.000000e+00> : vector<2x8x8xf32>
    %42 = tpu.matmul %39, %40, %cst_26 {dimension_numbers = #tpu.dot_dimension_numbers<[2], [2], [1], [1], [0, 0, 0, 1, 1, 1], [0], [0]>} : vector<2x8x8xf32>, vector<2x8x8xf32>, vector<2x8x8xf32> -> vector<2x8x8xf32>
    "tpu.trace_stop"() : () -> ()
    %cst_27 = arith.constant dense<0xFF800000> : vector<2x8xf32>
    %43 = vector.multi_reduction <maximumf>, %42, %cst_27 [2] : vector<2x8x8xf32> to vector<2x8xf32>
    %44 = vector.shape_cast %43 : vector<2x8xf32> to vector<2x8x1xf32>
    %45 = vector.broadcast %44 : vector<2x8x1xf32> to vector<2x8x8xf32>
    %46 = arith.subf %42, %45 : vector<2x8x8xf32>
    %47 = math.exp %46 : vector<2x8x8xf32>
    %cst_28 = arith.constant dense<0.000000e+00> : vector<2x8xf32>
    %48 = vector.multi_reduction <add>, %47, %cst_28 [2] : vector<2x8x8xf32> to vector<2x8xf32>
    %49 = vector.shape_cast %48 : vector<2x8xf32> to vector<2x8x1xf32>
    %50 = tpu.reciprocal %49 {approx = true} : vector<2x8x1xf32> -> vector<2x8x1xf32>
    %51 = vector.broadcast %50 : vector<2x8x1xf32> to vector<2x8x8xf32>
    %52 = arith.mulf %47, %51 : vector<2x8x8xf32>
    "tpu.trace_start"() <{level = 10 : i32, message = "bqk,bkd->bqd"}> : () -> ()
    %cst_29 = arith.constant dense<0.000000e+00> : vector<2x8x8xf32>
    %53 = tpu.matmul %52, %41, %cst_29 {dimension_numbers = #tpu.dot_dimension_numbers<[2], [1], [1], [2], [0, 0, 0, 1, 1, 2], [0], [0]>} : vector<2x8x8xf32>, vector<2x8x8xf32>, vector<2x8x8xf32> -> vector<2x8x8xf32>
    "tpu.trace_stop"() : () -> ()
    %54 = vector.shape_cast %53 : vector<2x8x8xf32> to vector<16x8xf32>
    %55 = vector.extract_strided_slice %18 {offsets = [0, 0, 0], sizes = [1, 8, 32], strides = [1, 1, 1]} : vector<4x8x32xbf16> to vector<1x8x32xbf16>
    %56 = vector.shape_cast %55 : vector<1x8x32xbf16> to vector<8x32xbf16>
    %57 = arith.truncf %54 : vector<16x8xf32> to vector<16x8xbf16>
    %cst_30 = arith.constant dense<0.000000e+00> : vector<16x32xf32>
    %58 = tpu.matmul %57, %56, %cst_30 {dimension_numbers = #tpu.dot_dimension_numbers<[1], [0], [0], [1], [0, 0, 1, 1], [], []>} : vector<16x8xbf16>, vector<8x32xbf16>, vector<16x32xf32> -> vector<16x32xf32>
    %59 = arith.addf %38, %58 : vector<16x32xf32>
    %60 = vector.extract_strided_slice %37 {offsets = [0, 0, 8], sizes = [2, 8, 8], strides = [1, 1, 1]} : vector<2x8x96xf32> to vector<2x8x8xf32>
    %61 = vector.extract_strided_slice %37 {offsets = [0, 0, 40], sizes = [2, 8, 8], strides = [1, 1, 1]} : vector<2x8x96xf32> to vector<2x8x8xf32>
    %62 = vector.extract_strided_slice %37 {offsets = [0, 0, 72], sizes = [2, 8, 8], strides = [1, 1, 1]} : vector<2x8x96xf32> to vector<2x8x8xf32>
    "tpu.trace_start"() <{level = 10 : i32, message = "bqd,bkd->bqk"}> : () -> ()
    %cst_31 = arith.constant dense<0.000000e+00> : vector<2x8x8xf32>
    %63 = tpu.matmul %60, %61, %cst_31 {dimension_numbers = #tpu.dot_dimension_numbers<[2], [2], [1], [1], [0, 0, 0, 1, 1, 1], [0], [0]>} : vector<2x8x8xf32>, vector<2x8x8xf32>, vector<2x8x8xf32> -> vector<2x8x8xf32>
    "tpu.trace_stop"() : () -> ()
    %cst_32 = arith.constant dense<0xFF800000> : vector<2x8xf32>
    %64 = vector.multi_reduction <maximumf>, %63, %cst_32 [2] : vector<2x8x8xf32> to vector<2x8xf32>
    %65 = vector.shape_cast %64 : vector<2x8xf32> to vector<2x8x1xf32>
    %66 = vector.broadcast %65 : vector<2x8x1xf32> to vector<2x8x8xf32>
    %67 = arith.subf %63, %66 : vector<2x8x8xf32>
    %68 = math.exp %67 : vector<2x8x8xf32>
    %cst_33 = arith.constant dense<0.000000e+00> : vector<2x8xf32>
    %69 = vector.multi_reduction <add>, %68, %cst_33 [2] : vector<2x8x8xf32> to vector<2x8xf32>
    %70 = vector.shape_cast %69 : vector<2x8xf32> to vector<2x8x1xf32>
    %71 = tpu.reciprocal %70 {approx = true} : vector<2x8x1xf32> -> vector<2x8x1xf32>
    %72 = vector.broadcast %71 : vector<2x8x1xf32> to vector<2x8x8xf32>
    %73 = arith.mulf %68, %72 : vector<2x8x8xf32>
    "tpu.trace_start"() <{level = 10 : i32, message = "bqk,bkd->bqd"}> : () -> ()
    %cst_34 = arith.constant dense<0.000000e+00> : vector<2x8x8xf32>
    %74 = tpu.matmul %73, %62, %cst_34 {dimension_numbers = #tpu.dot_dimension_numbers<[2], [1], [1], [2], [0, 0, 0, 1, 1, 2], [0], [0]>} : vector<2x8x8xf32>, vector<2x8x8xf32>, vector<2x8x8xf32> -> vector<2x8x8xf32>
    "tpu.trace_stop"() : () -> ()
    %75 = vector.shape_cast %74 : vector<2x8x8xf32> to vector<16x8xf32>
    %76 = vector.extract_strided_slice %18 {offsets = [1, 0, 0], sizes = [1, 8, 32], strides = [1, 1, 1]} : vector<4x8x32xbf16> to vector<1x8x32xbf16>
    %77 = vector.shape_cast %76 : vector<1x8x32xbf16> to vector<8x32xbf16>
    %78 = arith.truncf %75 : vector<16x8xf32> to vector<16x8xbf16>
    %cst_35 = arith.constant dense<0.000000e+00> : vector<16x32xf32>
    %79 = tpu.matmul %78, %77, %cst_35 {dimension_numbers = #tpu.dot_dimension_numbers<[1], [0], [0], [1], [0, 0, 1, 1], [], []>} : vector<16x8xbf16>, vector<8x32xbf16>, vector<16x32xf32> -> vector<16x32xf32>
    %80 = arith.addf %59, %79 : vector<16x32xf32>
    %81 = vector.extract_strided_slice %37 {offsets = [0, 0, 16], sizes = [2, 8, 8], strides = [1, 1, 1]} : vector<2x8x96xf32> to vector<2x8x8xf32>
    %82 = vector.extract_strided_slice %37 {offsets = [0, 0, 48], sizes = [2, 8, 8], strides = [1, 1, 1]} : vector<2x8x96xf32> to vector<2x8x8xf32>
    %83 = vector.extract_strided_slice %37 {offsets = [0, 0, 80], sizes = [2, 8, 8], strides = [1, 1, 1]} : vector<2x8x96xf32> to vector<2x8x8xf32>
    "tpu.trace_start"() <{level = 10 : i32, message = "bqd,bkd->bqk"}> : () -> ()
    %cst_36 = arith.constant dense<0.000000e+00> : vector<2x8x8xf32>
    %84 = tpu.matmul %81, %82, %cst_36 {dimension_numbers = #tpu.dot_dimension_numbers<[2], [2], [1], [1], [0, 0, 0, 1, 1, 1], [0], [0]>} : vector<2x8x8xf32>, vector<2x8x8xf32>, vector<2x8x8xf32> -> vector<2x8x8xf32>
    "tpu.trace_stop"() : () -> ()
    %cst_37 = arith.constant dense<0xFF800000> : vector<2x8xf32>
    %85 = vector.multi_reduction <maximumf>, %84, %cst_37 [2] : vector<2x8x8xf32> to vector<2x8xf32>
    %86 = vector.shape_cast %85 : vector<2x8xf32> to vector<2x8x1xf32>
    %87 = vector.broadcast %86 : vector<2x8x1xf32> to vector<2x8x8xf32>
    %88 = arith.subf %84, %87 : vector<2x8x8xf32>
    %89 = math.exp %88 : vector<2x8x8xf32>
    %cst_38 = arith.constant dense<0.000000e+00> : vector<2x8xf32>
    %90 = vector.multi_reduction <add>, %89, %cst_38 [2] : vector<2x8x8xf32> to vector<2x8xf32>
    %91 = vector.shape_cast %90 : vector<2x8xf32> to vector<2x8x1xf32>
    %92 = tpu.reciprocal %91 {approx = true} : vector<2x8x1xf32> -> vector<2x8x1xf32>
    %93 = vector.broadcast %92 : vector<2x8x1xf32> to vector<2x8x8xf32>
    %94 = arith.mulf %89, %93 : vector<2x8x8xf32>
    "tpu.trace_start"() <{level = 10 : i32, message = "bqk,bkd->bqd"}> : () -> ()
    %cst_39 = arith.constant dense<0.000000e+00> : vector<2x8x8xf32>
    %95 = tpu.matmul %94, %83, %cst_39 {dimension_numbers = #tpu.dot_dimension_numbers<[2], [1], [1], [2], [0, 0, 0, 1, 1, 2], [0], [0]>} : vector<2x8x8xf32>, vector<2x8x8xf32>, vector<2x8x8xf32> -> vector<2x8x8xf32>
    "tpu.trace_stop"() : () -> ()
    %96 = vector.shape_cast %95 : vector<2x8x8xf32> to vector<16x8xf32>
    %97 = vector.extract_strided_slice %18 {offsets = [2, 0, 0], sizes = [1, 8, 32], strides = [1, 1, 1]} : vector<4x8x32xbf16> to vector<1x8x32xbf16>
    %98 = vector.shape_cast %97 : vector<1x8x32xbf16> to vector<8x32xbf16>
    %99 = arith.truncf %96 : vector<16x8xf32> to vector<16x8xbf16>
    %cst_40 = arith.constant dense<0.000000e+00> : vector<16x32xf32>
    %100 = tpu.matmul %99, %98, %cst_40 {dimension_numbers = #tpu.dot_dimension_numbers<[1], [0], [0], [1], [0, 0, 1, 1], [], []>} : vector<16x8xbf16>, vector<8x32xbf16>, vector<16x32xf32> -> vector<16x32xf32>
    %101 = arith.addf %80, %100 : vector<16x32xf32>
    %102 = vector.extract_strided_slice %37 {offsets = [0, 0, 24], sizes = [2, 8, 8], strides = [1, 1, 1]} : vector<2x8x96xf32> to vector<2x8x8xf32>
    %103 = vector.extract_strided_slice %37 {offsets = [0, 0, 56], sizes = [2, 8, 8], strides = [1, 1, 1]} : vector<2x8x96xf32> to vector<2x8x8xf32>
    %104 = vector.extract_strided_slice %37 {offsets = [0, 0, 88], sizes = [2, 8, 8], strides = [1, 1, 1]} : vector<2x8x96xf32> to vector<2x8x8xf32>
    "tpu.trace_start"() <{level = 10 : i32, message = "bqd,bkd->bqk"}> : () -> ()
    %cst_41 = arith.constant dense<0.000000e+00> : vector<2x8x8xf32>
    %105 = tpu.matmul %102, %103, %cst_41 {dimension_numbers = #tpu.dot_dimension_numbers<[2], [2], [1], [1], [0, 0, 0, 1, 1, 1], [0], [0]>} : vector<2x8x8xf32>, vector<2x8x8xf32>, vector<2x8x8xf32> -> vector<2x8x8xf32>
    "tpu.trace_stop"() : () -> ()
    %cst_42 = arith.constant dense<0xFF800000> : vector<2x8xf32>
    %106 = vector.multi_reduction <maximumf>, %105, %cst_42 [2] : vector<2x8x8xf32> to vector<2x8xf32>
    %107 = vector.shape_cast %106 : vector<2x8xf32> to vector<2x8x1xf32>
    %108 = vector.broadcast %107 : vector<2x8x1xf32> to vector<2x8x8xf32>
    %109 = arith.subf %105, %108 : vector<2x8x8xf32>
    %110 = math.exp %109 : vector<2x8x8xf32>
    %cst_43 = arith.constant dense<0.000000e+00> : vector<2x8xf32>
    %111 = vector.multi_reduction <add>, %110, %cst_43 [2] : vector<2x8x8xf32> to vector<2x8xf32>
    %112 = vector.shape_cast %111 : vector<2x8xf32> to vector<2x8x1xf32>
    %113 = tpu.reciprocal %112 {approx = true} : vector<2x8x1xf32> -> vector<2x8x1xf32>
    %114 = vector.broadcast %113 : vector<2x8x1xf32> to vector<2x8x8xf32>
    %115 = arith.mulf %110, %114 : vector<2x8x8xf32>
    "tpu.trace_start"() <{level = 10 : i32, message = "bqk,bkd->bqd"}> : () -> ()
    %cst_44 = arith.constant dense<0.000000e+00> : vector<2x8x8xf32>
    %116 = tpu.matmul %115, %104, %cst_44 {dimension_numbers = #tpu.dot_dimension_numbers<[2], [1], [1], [2], [0, 0, 0, 1, 1, 2], [0], [0]>} : vector<2x8x8xf32>, vector<2x8x8xf32>, vector<2x8x8xf32> -> vector<2x8x8xf32>
    "tpu.trace_stop"() : () -> ()
    %117 = vector.shape_cast %116 : vector<2x8x8xf32> to vector<16x8xf32>
    %118 = vector.extract_strided_slice %18 {offsets = [3, 0, 0], sizes = [1, 8, 32], strides = [1, 1, 1]} : vector<4x8x32xbf16> to vector<1x8x32xbf16>
    %119 = vector.shape_cast %118 : vector<1x8x32xbf16> to vector<8x32xbf16>
    %120 = arith.truncf %117 : vector<16x8xf32> to vector<16x8xbf16>
    %cst_45 = arith.constant dense<0.000000e+00> : vector<16x32xf32>
    %121 = tpu.matmul %120, %119, %cst_45 {dimension_numbers = #tpu.dot_dimension_numbers<[1], [0], [0], [1], [0, 0, 1, 1], [], []>} : vector<16x8xbf16>, vector<8x32xbf16>, vector<16x32xf32> -> vector<16x32xf32>
    %122 = arith.addf %101, %121 : vector<16x32xf32>
    %123 = vector.broadcast %26 : vector<1x32xf32> to vector<16x32xf32>
    %124 = arith.addf %122, %123 : vector<16x32xf32>
    %125 = arith.addf %14, %124 : vector<16x32xf32>
    %cst_46 = arith.constant dense<0.000000e+00> : vector<16xf32>
    %126 = vector.multi_reduction <add>, %125, %cst_46 [1] : vector<16x32xf32> to vector<16xf32>
    %127 = vector.shape_cast %126 : vector<16xf32> to vector<16x1xf32>
    %cst_47 = arith.constant 3.200000e+01 : f32
    %128 = vector.broadcast %cst_47 : f32 to vector<16x1xf32>
    %129 = arith.divf %127, %128 : vector<16x1xf32>
    %130 = arith.mulf %125, %125 : vector<16x32xf32>
    %cst_48 = arith.constant dense<0.000000e+00> : vector<16xf32>
    %131 = vector.multi_reduction <add>, %130, %cst_48 [1] : vector<16x32xf32> to vector<16xf32>
    %132 = vector.shape_cast %131 : vector<16xf32> to vector<16x1xf32>
    %cst_49 = arith.constant 3.200000e+01 : f32
    %133 = vector.broadcast %cst_49 : f32 to vector<16x1xf32>
    %134 = arith.divf %132, %133 : vector<16x1xf32>
    %135 = arith.mulf %129, %129 : vector<16x1xf32>
    %136 = arith.subf %134, %135 : vector<16x1xf32>
    %cst_50 = arith.constant 0.000000e+00 : f32
    %137 = vector.broadcast %cst_50 : f32 to vector<16x1xf32>
    %138 = arith.maximumf %136, %137 : vector<16x1xf32>
    %139 = vector.broadcast %129 : vector<16x1xf32> to vector<16x32xf32>
    %140 = arith.subf %125, %139 : vector<16x32xf32>
    %cst_51 = arith.constant 9.99999974E-6 : f32
    %141 = vector.broadcast %cst_51 : f32 to vector<16x1xf32>
    %142 = arith.addf %138, %141 : vector<16x1xf32>
    %143 = math.rsqrt %142 : vector<16x1xf32>
    %144 = vector.broadcast %143 : vector<16x1xf32> to vector<16x32xf32>
    %145 = arith.mulf %140, %144 : vector<16x32xf32>
    %146 = vector.broadcast %29 : vector<1x32xf32> to vector<16x32xf32>
    %147 = arith.mulf %145, %146 : vector<16x32xf32>
    %148 = vector.broadcast %30 : vector<1x32xf32> to vector<16x32xf32>
    %149 = arith.addf %147, %148 : vector<16x32xf32>
    %150 = arith.truncf %149 : vector<16x32xf32> to vector<16x32xbf16>
    %cst_52 = arith.constant dense<0.000000e+00> : vector<16x64xf32>
    %151 = tpu.matmul %150, %20, %cst_52 {dimension_numbers = #tpu.dot_dimension_numbers<[1], [0], [0], [1], [0, 0, 1, 1], [], []>} : vector<16x32xbf16>, vector<32x64xbf16>, vector<16x64xf32> -> vector<16x64xf32>
    %152 = vector.broadcast %27 : vector<1x64xf32> to vector<16x64xf32>
    %153 = arith.addf %151, %152 : vector<16x64xf32>
    %cst_53 = arith.constant 0.000000e+00 : f32
    %154 = vector.broadcast %cst_53 : f32 to vector<16x64xf32>
    %155 = arith.maximumf %153, %154 : vector<16x64xf32>
    %156 = arith.truncf %155 : vector<16x64xf32> to vector<16x64xbf16>
    %cst_54 = arith.constant dense<0.000000e+00> : vector<16x32xf32>
    %157 = tpu.matmul %156, %22, %cst_54 {dimension_numbers = #tpu.dot_dimension_numbers<[1], [0], [0], [1], [0, 0, 1, 1], [], []>} : vector<16x64xbf16>, vector<64x32xbf16>, vector<16x32xf32> -> vector<16x32xf32>
    %158 = vector.broadcast %28 : vector<1x32xf32> to vector<16x32xf32>
    %159 = arith.addf %157, %158 : vector<16x32xf32>
    %160 = arith.addf %149, %159 : vector<16x32xf32>
    %cst_55 = arith.constant dense<0.000000e+00> : vector<16xf32>
    %161 = vector.multi_reduction <add>, %160, %cst_55 [1] : vector<16x32xf32> to vector<16xf32>
    %162 = vector.shape_cast %161 : vector<16xf32> to vector<16x1xf32>
    %cst_56 = arith.constant 3.200000e+01 : f32
    %163 = vector.broadcast %cst_56 : f32 to vector<16x1xf32>
    %164 = arith.divf %162, %163 : vector<16x1xf32>
    %165 = arith.mulf %160, %160 : vector<16x32xf32>
    %cst_57 = arith.constant dense<0.000000e+00> : vector<16xf32>
    %166 = vector.multi_reduction <add>, %165, %cst_57 [1] : vector<16x32xf32> to vector<16xf32>
    %167 = vector.shape_cast %166 : vector<16xf32> to vector<16x1xf32>
    %cst_58 = arith.constant 3.200000e+01 : f32
    %168 = vector.broadcast %cst_58 : f32 to vector<16x1xf32>
    %169 = arith.divf %167, %168 : vector<16x1xf32>
    %170 = arith.mulf %164, %164 : vector<16x1xf32>
    %171 = arith.subf %169, %170 : vector<16x1xf32>
    %cst_59 = arith.constant 0.000000e+00 : f32
    %172 = vector.broadcast %cst_59 : f32 to vector<16x1xf32>
    %173 = arith.maximumf %171, %172 : vector<16x1xf32>
    %174 = vector.broadcast %164 : vector<16x1xf32> to vector<16x32xf32>
    %175 = arith.subf %160, %174 : vector<16x32xf32>
    %cst_60 = arith.constant 9.99999974E-6 : f32
    %176 = vector.broadcast %cst_60 : f32 to vector<16x1xf32>
    %177 = arith.addf %173, %176 : vector<16x1xf32>
    %178 = math.rsqrt %177 : vector<16x1xf32>
    %179 = vector.broadcast %178 : vector<16x1xf32> to vector<16x32xf32>
    %180 = arith.mulf %175, %179 : vector<16x32xf32>
    %181 = vector.broadcast %31 : vector<1x32xf32> to vector<16x32xf32>
    %182 = arith.mulf %180, %181 : vector<16x32xf32>
    %183 = vector.broadcast %32 : vector<1x32xf32> to vector<16x32xf32>
    %184 = arith.addf %182, %183 : vector<16x32xf32>
    %c1 = arith.constant 1 : index
    %c0_61 = arith.constant 0 : index
    %c0_62 = arith.constant 0 : index
    %185 = vector.load %arg4[%c1, %c0_61, %c0_62] : memref<2x32x96xbf16, #tpu.memory_space<vmem>>, vector<1x32x96xbf16>
    %186 = vector.shape_cast %185 : vector<1x32x96xbf16> to vector<32x96xbf16>
    %c1_63 = arith.constant 1 : index
    %c0_64 = arith.constant 0 : index
    %c0_65 = arith.constant 0 : index
    %c0_66 = arith.constant 0 : index
    %187 = vector.load %arg5[%c1_63, %c0_64, %c0_65, %c0_66] : memref<2x4x8x32xbf16, #tpu.memory_space<vmem>>, vector<1x4x8x32xbf16>
    %188 = vector.shape_cast %187 : vector<1x4x8x32xbf16> to vector<4x8x32xbf16>
    %c1_67 = arith.constant 1 : index
    %c0_68 = arith.constant 0 : index
    %c0_69 = arith.constant 0 : index
    %189 = vector.load %arg6[%c1_67, %c0_68, %c0_69] : memref<2x32x64xbf16, #tpu.memory_space<vmem>>, vector<1x32x64xbf16>
    %190 = vector.shape_cast %189 : vector<1x32x64xbf16> to vector<32x64xbf16>
    %c1_70 = arith.constant 1 : index
    %c0_71 = arith.constant 0 : index
    %c0_72 = arith.constant 0 : index
    %191 = vector.load %arg7[%c1_70, %c0_71, %c0_72] : memref<2x64x32xbf16, #tpu.memory_space<vmem>>, vector<1x64x32xbf16>
    %192 = vector.shape_cast %191 : vector<1x64x32xbf16> to vector<64x32xbf16>
    %c1_73 = arith.constant 1 : index
    %c0_74 = arith.constant 0 : index
    %c0_75 = arith.constant 0 : index
    %193 = vector.load %arg8[%c1_73, %c0_74, %c0_75] : memref<2x8x96xf32, #tpu.memory_space<vmem>>, vector<1x8x96xf32>
    %194 = vector.shape_cast %193 : vector<1x8x96xf32> to vector<8x96xf32>
    %195 = vector.extract_strided_slice %194 {offsets = [0, 0], sizes = [1, 96], strides = [1, 1]} : vector<8x96xf32> to vector<1x96xf32>
    %196 = vector.extract_strided_slice %194 {offsets = [1, 0], sizes = [1, 32], strides = [1, 1]} : vector<8x96xf32> to vector<1x32xf32>
    %197 = vector.extract_strided_slice %194 {offsets = [2, 0], sizes = [1, 64], strides = [1, 1]} : vector<8x96xf32> to vector<1x64xf32>
    %198 = vector.extract_strided_slice %194 {offsets = [3, 0], sizes = [1, 32], strides = [1, 1]} : vector<8x96xf32> to vector<1x32xf32>
    %199 = vector.extract_strided_slice %194 {offsets = [4, 0], sizes = [1, 32], strides = [1, 1]} : vector<8x96xf32> to vector<1x32xf32>
    %200 = vector.extract_strided_slice %194 {offsets = [5, 0], sizes = [1, 32], strides = [1, 1]} : vector<8x96xf32> to vector<1x32xf32>
    %201 = vector.extract_strided_slice %194 {offsets = [6, 0], sizes = [1, 32], strides = [1, 1]} : vector<8x96xf32> to vector<1x32xf32>
    %202 = vector.extract_strided_slice %194 {offsets = [7, 0], sizes = [1, 32], strides = [1, 1]} : vector<8x96xf32> to vector<1x32xf32>
    %203 = arith.truncf %184 : vector<16x32xf32> to vector<16x32xbf16>
    %cst_76 = arith.constant dense<0.000000e+00> : vector<16x96xf32>
    %204 = tpu.matmul %203, %186, %cst_76 {dimension_numbers = #tpu.dot_dimension_numbers<[1], [0], [0], [1], [0, 0, 1, 1], [], []>} : vector<16x32xbf16>, vector<32x96xbf16>, vector<16x96xf32> -> vector<16x96xf32>
    %205 = vector.broadcast %195 : vector<1x96xf32> to vector<16x96xf32>
    %206 = arith.addf %204, %205 : vector<16x96xf32>
    %207 = vector.shape_cast %206 : vector<16x96xf32> to vector<2x8x96xf32>
    %cst_77 = arith.constant 0.000000e+00 : f32
    %208 = vector.broadcast %cst_77 : f32 to vector<16x32xf32>
    %209 = vector.extract_strided_slice %207 {offsets = [0, 0, 0], sizes = [2, 8, 8], strides = [1, 1, 1]} : vector<2x8x96xf32> to vector<2x8x8xf32>
    %210 = vector.extract_strided_slice %207 {offsets = [0, 0, 32], sizes = [2, 8, 8], strides = [1, 1, 1]} : vector<2x8x96xf32> to vector<2x8x8xf32>
    %211 = vector.extract_strided_slice %207 {offsets = [0, 0, 64], sizes = [2, 8, 8], strides = [1, 1, 1]} : vector<2x8x96xf32> to vector<2x8x8xf32>
    "tpu.trace_start"() <{level = 10 : i32, message = "bqd,bkd->bqk"}> : () -> ()
    %cst_78 = arith.constant dense<0.000000e+00> : vector<2x8x8xf32>
    %212 = tpu.matmul %209, %210, %cst_78 {dimension_numbers = #tpu.dot_dimension_numbers<[2], [2], [1], [1], [0, 0, 0, 1, 1, 1], [0], [0]>} : vector<2x8x8xf32>, vector<2x8x8xf32>, vector<2x8x8xf32> -> vector<2x8x8xf32>
    "tpu.trace_stop"() : () -> ()
    %cst_79 = arith.constant dense<0xFF800000> : vector<2x8xf32>
    %213 = vector.multi_reduction <maximumf>, %212, %cst_79 [2] : vector<2x8x8xf32> to vector<2x8xf32>
    %214 = vector.shape_cast %213 : vector<2x8xf32> to vector<2x8x1xf32>
    %215 = vector.broadcast %214 : vector<2x8x1xf32> to vector<2x8x8xf32>
    %216 = arith.subf %212, %215 : vector<2x8x8xf32>
    %217 = math.exp %216 : vector<2x8x8xf32>
    %cst_80 = arith.constant dense<0.000000e+00> : vector<2x8xf32>
    %218 = vector.multi_reduction <add>, %217, %cst_80 [2] : vector<2x8x8xf32> to vector<2x8xf32>
    %219 = vector.shape_cast %218 : vector<2x8xf32> to vector<2x8x1xf32>
    %220 = tpu.reciprocal %219 {approx = true} : vector<2x8x1xf32> -> vector<2x8x1xf32>
    %221 = vector.broadcast %220 : vector<2x8x1xf32> to vector<2x8x8xf32>
    %222 = arith.mulf %217, %221 : vector<2x8x8xf32>
    "tpu.trace_start"() <{level = 10 : i32, message = "bqk,bkd->bqd"}> : () -> ()
    %cst_81 = arith.constant dense<0.000000e+00> : vector<2x8x8xf32>
    %223 = tpu.matmul %222, %211, %cst_81 {dimension_numbers = #tpu.dot_dimension_numbers<[2], [1], [1], [2], [0, 0, 0, 1, 1, 2], [0], [0]>} : vector<2x8x8xf32>, vector<2x8x8xf32>, vector<2x8x8xf32> -> vector<2x8x8xf32>
    "tpu.trace_stop"() : () -> ()
    %224 = vector.shape_cast %223 : vector<2x8x8xf32> to vector<16x8xf32>
    %225 = vector.extract_strided_slice %188 {offsets = [0, 0, 0], sizes = [1, 8, 32], strides = [1, 1, 1]} : vector<4x8x32xbf16> to vector<1x8x32xbf16>
    %226 = vector.shape_cast %225 : vector<1x8x32xbf16> to vector<8x32xbf16>
    %227 = arith.truncf %224 : vector<16x8xf32> to vector<16x8xbf16>
    %cst_82 = arith.constant dense<0.000000e+00> : vector<16x32xf32>
    %228 = tpu.matmul %227, %226, %cst_82 {dimension_numbers = #tpu.dot_dimension_numbers<[1], [0], [0], [1], [0, 0, 1, 1], [], []>} : vector<16x8xbf16>, vector<8x32xbf16>, vector<16x32xf32> -> vector<16x32xf32>
    %229 = arith.addf %208, %228 : vector<16x32xf32>
    %230 = vector.extract_strided_slice %207 {offsets = [0, 0, 8], sizes = [2, 8, 8], strides = [1, 1, 1]} : vector<2x8x96xf32> to vector<2x8x8xf32>
    %231 = vector.extract_strided_slice %207 {offsets = [0, 0, 40], sizes = [2, 8, 8], strides = [1, 1, 1]} : vector<2x8x96xf32> to vector<2x8x8xf32>
    %232 = vector.extract_strided_slice %207 {offsets = [0, 0, 72], sizes = [2, 8, 8], strides = [1, 1, 1]} : vector<2x8x96xf32> to vector<2x8x8xf32>
    "tpu.trace_start"() <{level = 10 : i32, message = "bqd,bkd->bqk"}> : () -> ()
    %cst_83 = arith.constant dense<0.000000e+00> : vector<2x8x8xf32>
    %233 = tpu.matmul %230, %231, %cst_83 {dimension_numbers = #tpu.dot_dimension_numbers<[2], [2], [1], [1], [0, 0, 0, 1, 1, 1], [0], [0]>} : vector<2x8x8xf32>, vector<2x8x8xf32>, vector<2x8x8xf32> -> vector<2x8x8xf32>
    "tpu.trace_stop"() : () -> ()
    %cst_84 = arith.constant dense<0xFF800000> : vector<2x8xf32>
    %234 = vector.multi_reduction <maximumf>, %233, %cst_84 [2] : vector<2x8x8xf32> to vector<2x8xf32>
    %235 = vector.shape_cast %234 : vector<2x8xf32> to vector<2x8x1xf32>
    %236 = vector.broadcast %235 : vector<2x8x1xf32> to vector<2x8x8xf32>
    %237 = arith.subf %233, %236 : vector<2x8x8xf32>
    %238 = math.exp %237 : vector<2x8x8xf32>
    %cst_85 = arith.constant dense<0.000000e+00> : vector<2x8xf32>
    %239 = vector.multi_reduction <add>, %238, %cst_85 [2] : vector<2x8x8xf32> to vector<2x8xf32>
    %240 = vector.shape_cast %239 : vector<2x8xf32> to vector<2x8x1xf32>
    %241 = tpu.reciprocal %240 {approx = true} : vector<2x8x1xf32> -> vector<2x8x1xf32>
    %242 = vector.broadcast %241 : vector<2x8x1xf32> to vector<2x8x8xf32>
    %243 = arith.mulf %238, %242 : vector<2x8x8xf32>
    "tpu.trace_start"() <{level = 10 : i32, message = "bqk,bkd->bqd"}> : () -> ()
    %cst_86 = arith.constant dense<0.000000e+00> : vector<2x8x8xf32>
    %244 = tpu.matmul %243, %232, %cst_86 {dimension_numbers = #tpu.dot_dimension_numbers<[2], [1], [1], [2], [0, 0, 0, 1, 1, 2], [0], [0]>} : vector<2x8x8xf32>, vector<2x8x8xf32>, vector<2x8x8xf32> -> vector<2x8x8xf32>
    "tpu.trace_stop"() : () -> ()
    %245 = vector.shape_cast %244 : vector<2x8x8xf32> to vector<16x8xf32>
    %246 = vector.extract_strided_slice %188 {offsets = [1, 0, 0], sizes = [1, 8, 32], strides = [1, 1, 1]} : vector<4x8x32xbf16> to vector<1x8x32xbf16>
    %247 = vector.shape_cast %246 : vector<1x8x32xbf16> to vector<8x32xbf16>
    %248 = arith.truncf %245 : vector<16x8xf32> to vector<16x8xbf16>
    %cst_87 = arith.constant dense<0.000000e+00> : vector<16x32xf32>
    %249 = tpu.matmul %248, %247, %cst_87 {dimension_numbers = #tpu.dot_dimension_numbers<[1], [0], [0], [1], [0, 0, 1, 1], [], []>} : vector<16x8xbf16>, vector<8x32xbf16>, vector<16x32xf32> -> vector<16x32xf32>
    %250 = arith.addf %229, %249 : vector<16x32xf32>
    %251 = vector.extract_strided_slice %207 {offsets = [0, 0, 16], sizes = [2, 8, 8], strides = [1, 1, 1]} : vector<2x8x96xf32> to vector<2x8x8xf32>
    %252 = vector.extract_strided_slice %207 {offsets = [0, 0, 48], sizes = [2, 8, 8], strides = [1, 1, 1]} : vector<2x8x96xf32> to vector<2x8x8xf32>
    %253 = vector.extract_strided_slice %207 {offsets = [0, 0, 80], sizes = [2, 8, 8], strides = [1, 1, 1]} : vector<2x8x96xf32> to vector<2x8x8xf32>
    "tpu.trace_start"() <{level = 10 : i32, message = "bqd,bkd->bqk"}> : () -> ()
    %cst_88 = arith.constant dense<0.000000e+00> : vector<2x8x8xf32>
    %254 = tpu.matmul %251, %252, %cst_88 {dimension_numbers = #tpu.dot_dimension_numbers<[2], [2], [1], [1], [0, 0, 0, 1, 1, 1], [0], [0]>} : vector<2x8x8xf32>, vector<2x8x8xf32>, vector<2x8x8xf32> -> vector<2x8x8xf32>
    "tpu.trace_stop"() : () -> ()
    %cst_89 = arith.constant dense<0xFF800000> : vector<2x8xf32>
    %255 = vector.multi_reduction <maximumf>, %254, %cst_89 [2] : vector<2x8x8xf32> to vector<2x8xf32>
    %256 = vector.shape_cast %255 : vector<2x8xf32> to vector<2x8x1xf32>
    %257 = vector.broadcast %256 : vector<2x8x1xf32> to vector<2x8x8xf32>
    %258 = arith.subf %254, %257 : vector<2x8x8xf32>
    %259 = math.exp %258 : vector<2x8x8xf32>
    %cst_90 = arith.constant dense<0.000000e+00> : vector<2x8xf32>
    %260 = vector.multi_reduction <add>, %259, %cst_90 [2] : vector<2x8x8xf32> to vector<2x8xf32>
    %261 = vector.shape_cast %260 : vector<2x8xf32> to vector<2x8x1xf32>
    %262 = tpu.reciprocal %261 {approx = true} : vector<2x8x1xf32> -> vector<2x8x1xf32>
    %263 = vector.broadcast %262 : vector<2x8x1xf32> to vector<2x8x8xf32>
    %264 = arith.mulf %259, %263 : vector<2x8x8xf32>
    "tpu.trace_start"() <{level = 10 : i32, message = "bqk,bkd->bqd"}> : () -> ()
    %cst_91 = arith.constant dense<0.000000e+00> : vector<2x8x8xf32>
    %265 = tpu.matmul %264, %253, %cst_91 {dimension_numbers = #tpu.dot_dimension_numbers<[2], [1], [1], [2], [0, 0, 0, 1, 1, 2], [0], [0]>} : vector<2x8x8xf32>, vector<2x8x8xf32>, vector<2x8x8xf32> -> vector<2x8x8xf32>
    "tpu.trace_stop"() : () -> ()
    %266 = vector.shape_cast %265 : vector<2x8x8xf32> to vector<16x8xf32>
    %267 = vector.extract_strided_slice %188 {offsets = [2, 0, 0], sizes = [1, 8, 32], strides = [1, 1, 1]} : vector<4x8x32xbf16> to vector<1x8x32xbf16>
    %268 = vector.shape_cast %267 : vector<1x8x32xbf16> to vector<8x32xbf16>
    %269 = arith.truncf %266 : vector<16x8xf32> to vector<16x8xbf16>
    %cst_92 = arith.constant dense<0.000000e+00> : vector<16x32xf32>
    %270 = tpu.matmul %269, %268, %cst_92 {dimension_numbers = #tpu.dot_dimension_numbers<[1], [0], [0], [1], [0, 0, 1, 1], [], []>} : vector<16x8xbf16>, vector<8x32xbf16>, vector<16x32xf32> -> vector<16x32xf32>
    %271 = arith.addf %250, %270 : vector<16x32xf32>
    %272 = vector.extract_strided_slice %207 {offsets = [0, 0, 24], sizes = [2, 8, 8], strides = [1, 1, 1]} : vector<2x8x96xf32> to vector<2x8x8xf32>
    %273 = vector.extract_strided_slice %207 {offsets = [0, 0, 56], sizes = [2, 8, 8], strides = [1, 1, 1]} : vector<2x8x96xf32> to vector<2x8x8xf32>
    %274 = vector.extract_strided_slice %207 {offsets = [0, 0, 88], sizes = [2, 8, 8], strides = [1, 1, 1]} : vector<2x8x96xf32> to vector<2x8x8xf32>
    "tpu.trace_start"() <{level = 10 : i32, message = "bqd,bkd->bqk"}> : () -> ()
    %cst_93 = arith.constant dense<0.000000e+00> : vector<2x8x8xf32>
    %275 = tpu.matmul %272, %273, %cst_93 {dimension_numbers = #tpu.dot_dimension_numbers<[2], [2], [1], [1], [0, 0, 0, 1, 1, 1], [0], [0]>} : vector<2x8x8xf32>, vector<2x8x8xf32>, vector<2x8x8xf32> -> vector<2x8x8xf32>
    "tpu.trace_stop"() : () -> ()
    %cst_94 = arith.constant dense<0xFF800000> : vector<2x8xf32>
    %276 = vector.multi_reduction <maximumf>, %275, %cst_94 [2] : vector<2x8x8xf32> to vector<2x8xf32>
    %277 = vector.shape_cast %276 : vector<2x8xf32> to vector<2x8x1xf32>
    %278 = vector.broadcast %277 : vector<2x8x1xf32> to vector<2x8x8xf32>
    %279 = arith.subf %275, %278 : vector<2x8x8xf32>
    %280 = math.exp %279 : vector<2x8x8xf32>
    %cst_95 = arith.constant dense<0.000000e+00> : vector<2x8xf32>
    %281 = vector.multi_reduction <add>, %280, %cst_95 [2] : vector<2x8x8xf32> to vector<2x8xf32>
    %282 = vector.shape_cast %281 : vector<2x8xf32> to vector<2x8x1xf32>
    %283 = tpu.reciprocal %282 {approx = true} : vector<2x8x1xf32> -> vector<2x8x1xf32>
    %284 = vector.broadcast %283 : vector<2x8x1xf32> to vector<2x8x8xf32>
    %285 = arith.mulf %280, %284 : vector<2x8x8xf32>
    "tpu.trace_start"() <{level = 10 : i32, message = "bqk,bkd->bqd"}> : () -> ()
    %cst_96 = arith.constant dense<0.000000e+00> : vector<2x8x8xf32>
    %286 = tpu.matmul %285, %274, %cst_96 {dimension_numbers = #tpu.dot_dimension_numbers<[2], [1], [1], [2], [0, 0, 0, 1, 1, 2], [0], [0]>} : vector<2x8x8xf32>, vector<2x8x8xf32>, vector<2x8x8xf32> -> vector<2x8x8xf32>
    "tpu.trace_stop"() : () -> ()
    %287 = vector.shape_cast %286 : vector<2x8x8xf32> to vector<16x8xf32>
    %288 = vector.extract_strided_slice %188 {offsets = [3, 0, 0], sizes = [1, 8, 32], strides = [1, 1, 1]} : vector<4x8x32xbf16> to vector<1x8x32xbf16>
    %289 = vector.shape_cast %288 : vector<1x8x32xbf16> to vector<8x32xbf16>
    %290 = arith.truncf %287 : vector<16x8xf32> to vector<16x8xbf16>
    %cst_97 = arith.constant dense<0.000000e+00> : vector<16x32xf32>
    %291 = tpu.matmul %290, %289, %cst_97 {dimension_numbers = #tpu.dot_dimension_numbers<[1], [0], [0], [1], [0, 0, 1, 1], [], []>} : vector<16x8xbf16>, vector<8x32xbf16>, vector<16x32xf32> -> vector<16x32xf32>
    %292 = arith.addf %271, %291 : vector<16x32xf32>
    %293 = vector.broadcast %196 : vector<1x32xf32> to vector<16x32xf32>
    %294 = arith.addf %292, %293 : vector<16x32xf32>
    %295 = arith.addf %184, %294 : vector<16x32xf32>
    %cst_98 = arith.constant dense<0.000000e+00> : vector<16xf32>
    %296 = vector.multi_reduction <add>, %295, %cst_98 [1] : vector<16x32xf32> to vector<16xf32>
    %297 = vector.shape_cast %296 : vector<16xf32> to vector<16x1xf32>
    %cst_99 = arith.constant 3.200000e+01 : f32
    %298 = vector.broadcast %cst_99 : f32 to vector<16x1xf32>
    %299 = arith.divf %297, %298 : vector<16x1xf32>
    %300 = arith.mulf %295, %295 : vector<16x32xf32>
    %cst_100 = arith.constant dense<0.000000e+00> : vector<16xf32>
    %301 = vector.multi_reduction <add>, %300, %cst_100 [1] : vector<16x32xf32> to vector<16xf32>
    %302 = vector.shape_cast %301 : vector<16xf32> to vector<16x1xf32>
    %cst_101 = arith.constant 3.200000e+01 : f32
    %303 = vector.broadcast %cst_101 : f32 to vector<16x1xf32>
    %304 = arith.divf %302, %303 : vector<16x1xf32>
    %305 = arith.mulf %299, %299 : vector<16x1xf32>
    %306 = arith.subf %304, %305 : vector<16x1xf32>
    %cst_102 = arith.constant 0.000000e+00 : f32
    %307 = vector.broadcast %cst_102 : f32 to vector<16x1xf32>
    %308 = arith.maximumf %306, %307 : vector<16x1xf32>
    %309 = vector.broadcast %299 : vector<16x1xf32> to vector<16x32xf32>
    %310 = arith.subf %295, %309 : vector<16x32xf32>
    %cst_103 = arith.constant 9.99999974E-6 : f32
    %311 = vector.broadcast %cst_103 : f32 to vector<16x1xf32>
    %312 = arith.addf %308, %311 : vector<16x1xf32>
    %313 = math.rsqrt %312 : vector<16x1xf32>
    %314 = vector.broadcast %313 : vector<16x1xf32> to vector<16x32xf32>
    %315 = arith.mulf %310, %314 : vector<16x32xf32>
    %316 = vector.broadcast %199 : vector<1x32xf32> to vector<16x32xf32>
    %317 = arith.mulf %315, %316 : vector<16x32xf32>
    %318 = vector.broadcast %200 : vector<1x32xf32> to vector<16x32xf32>
    %319 = arith.addf %317, %318 : vector<16x32xf32>
    %320 = arith.truncf %319 : vector<16x32xf32> to vector<16x32xbf16>
    %cst_104 = arith.constant dense<0.000000e+00> : vector<16x64xf32>
    %321 = tpu.matmul %320, %190, %cst_104 {dimension_numbers = #tpu.dot_dimension_numbers<[1], [0], [0], [1], [0, 0, 1, 1], [], []>} : vector<16x32xbf16>, vector<32x64xbf16>, vector<16x64xf32> -> vector<16x64xf32>
    %322 = vector.broadcast %197 : vector<1x64xf32> to vector<16x64xf32>
    %323 = arith.addf %321, %322 : vector<16x64xf32>
    %cst_105 = arith.constant 0.000000e+00 : f32
    %324 = vector.broadcast %cst_105 : f32 to vector<16x64xf32>
    %325 = arith.maximumf %323, %324 : vector<16x64xf32>
    %326 = arith.truncf %325 : vector<16x64xf32> to vector<16x64xbf16>
    %cst_106 = arith.constant dense<0.000000e+00> : vector<16x32xf32>
    %327 = tpu.matmul %326, %192, %cst_106 {dimension_numbers = #tpu.dot_dimension_numbers<[1], [0], [0], [1], [0, 0, 1, 1], [], []>} : vector<16x64xbf16>, vector<64x32xbf16>, vector<16x32xf32> -> vector<16x32xf32>
    %328 = vector.broadcast %198 : vector<1x32xf32> to vector<16x32xf32>
    %329 = arith.addf %327, %328 : vector<16x32xf32>
    %330 = arith.addf %319, %329 : vector<16x32xf32>
    %cst_107 = arith.constant dense<0.000000e+00> : vector<16xf32>
    %331 = vector.multi_reduction <add>, %330, %cst_107 [1] : vector<16x32xf32> to vector<16xf32>
    %332 = vector.shape_cast %331 : vector<16xf32> to vector<16x1xf32>
    %cst_108 = arith.constant 3.200000e+01 : f32
    %333 = vector.broadcast %cst_108 : f32 to vector<16x1xf32>
    %334 = arith.divf %332, %333 : vector<16x1xf32>
    %335 = arith.mulf %330, %330 : vector<16x32xf32>
    %cst_109 = arith.constant dense<0.000000e+00> : vector<16xf32>
    %336 = vector.multi_reduction <add>, %335, %cst_109 [1] : vector<16x32xf32> to vector<16xf32>
    %337 = vector.shape_cast %336 : vector<16xf32> to vector<16x1xf32>
    %cst_110 = arith.constant 3.200000e+01 : f32
    %338 = vector.broadcast %cst_110 : f32 to vector<16x1xf32>
    %339 = arith.divf %337, %338 : vector<16x1xf32>
    %340 = arith.mulf %334, %334 : vector<16x1xf32>
    %341 = arith.subf %339, %340 : vector<16x1xf32>
    %cst_111 = arith.constant 0.000000e+00 : f32
    %342 = vector.broadcast %cst_111 : f32 to vector<16x1xf32>
    %343 = arith.maximumf %341, %342 : vector<16x1xf32>
    %344 = vector.broadcast %334 : vector<16x1xf32> to vector<16x32xf32>
    %345 = arith.subf %330, %344 : vector<16x32xf32>
    %cst_112 = arith.constant 9.99999974E-6 : f32
    %346 = vector.broadcast %cst_112 : f32 to vector<16x1xf32>
    %347 = arith.addf %343, %346 : vector<16x1xf32>
    %348 = math.rsqrt %347 : vector<16x1xf32>
    %349 = vector.broadcast %348 : vector<16x1xf32> to vector<16x32xf32>
    %350 = arith.mulf %345, %349 : vector<16x32xf32>
    %351 = vector.broadcast %201 : vector<1x32xf32> to vector<16x32xf32>
    %352 = arith.mulf %350, %351 : vector<16x32xf32>
    %353 = vector.broadcast %202 : vector<1x32xf32> to vector<16x32xf32>
    %354 = arith.addf %352, %353 : vector<16x32xf32>
    %355 = vector.shape_cast %354 : vector<16x32xf32> to vector<2x8x32xf32>
    %c0_113 = arith.constant 0 : index
    %c0_114 = arith.constant 0 : index
    %c0_115 = arith.constant 0 : index
    %356 = vector.load %arg9[%c0_113, %c0_114, %c0_115] : memref<2x8x32xf32, #tpu.memory_space<vmem>>, vector<2x8x32xf32>
    tpu.vector_store %arg9[%c0_113, %c0_114, %c0_115], %355 {strides = array<i32>} : memref<2x8x32xf32, #tpu.memory_space<vmem>>, vector<2x8x32xf32>,
    return
  }
}

</mosaic_0001>

<bundles_post_ra>
// kernel: forward.1
= control target key start
LH: loop header
LB: loop body
LE: loop exit
PB: predicated region body
PF: predicated region fallthrough
CT: control target
= control target key end

     0   :  { %s5249_s0 = inlined_call_operand.vmem [shape: f32[16,256], index: 0, kind: input, shape index: {}]   ;;  %s5250_s1 = inlined_call_operand.vmem [shape: bf16[256,32], index: 1, kind: input, shape index: {}]   ;;  %s5251_s2 = inlined_call_operand.vmem [shape: f32[1,32], index: 2, kind: input, shape index: {}]   ;;  %s5252_s3 = inlined_call_operand.vmem [shape: f32[8,32], index: 3, kind: input, shape index: {}]   ;;  %s5253_s4 = inlined_call_operand.vmem [shape: bf16[2,32,96], index: 4, kind: input, shape index: {}]   ;;  %s5254_s5 = inlined_call_operand.vmem [shape: bf16[2,4,8,32], index: 5, kind: input, shape index: {}]   ;;  %s5255_s6 = inlined_call_operand.vmem [shape: bf16[2,32,64], index: 6, kind: input, shape index: {}]   ;;  %s5256_s7 = inlined_call_operand.vmem [shape: bf16[2,64,32], index: 7, kind: input, shape index: {}]   ;;  %s5257_s8 = inlined_call_operand.vmem [shape: f32[2,8,96], index: 8, kind: input, shape index: {}]   ;;  %s5258_s9 = inlined_call_operand.hbm [shape: f32[2,8,32], index: 9, kind: output, shape index: {}]  }
   0x1   :  { %v4429_v0 = vld [vmem:[%s5250_s1 + $0x78] sm:$0xff]   ;;  %v4431_v2 = vld [vmem:[%s5250_s1 + $0x70] sm:$0xff]   ;;  %v4433_v4 = vld [vmem:[%s5250_s1 + $0x68] sm:$0xff]  }
   0x2   :  { %v4430_v1 = vld [vmem:[%s5250_s1 + $0x38] sm:$0xff]   ;;  %4025 = vmatprep.subr.bf16.mxu0 %v4429_v0  ;;  %v4432_v3 = vld [vmem:[%s5250_s1 + $0x30] sm:$0xff]   ;;  %v4434_v5 = vld [vmem:[%s5250_s1 + $0x28] sm:$0xff]  }
   0x3   :  { %4026 = vmatpush3.bf16.msra.mxu0 %v4430_v1  ;;  %v4435_v6 = vld [vmem:[%s5250_s1 + $0x60] sm:$0xff]   ;;  %v4437_v8 = vld [vmem:[%s5250_s1 + $0x58] sm:$0xff]   ;;  %v4439_v10 = vld [vmem:[%s5250_s1 + $0x50] sm:$0xff]  }
   0x4   :  { %4027 = vmatprep.subr.bf16.mxu0 %v4431_v2  ;;  %v4436_v7 = vld [vmem:[%s5250_s1 + $0x20] sm:$0xff]   ;;  %v4438_v9 = vld [vmem:[%s5250_s1 + $0x18] sm:$0xff]   ;;  %v35_v11 = vld [vmem:[%s5249_s0 + $0x8] sm:$0xff] }
   0x5   :  { %v37_v12 = vld [vmem:[%s5249_s0 + $0x18] sm:$0xff]  ;;  %v4440_v13 = vld [vmem:[%s5250_s1 + $0x10] sm:$0xff]   ;;  %v4441_v15 = vld [vmem:[%s5250_s1 + $0x48] sm:$0xff]  }
   0x6   :  { %v71_v14 = vpack.c.bf16 %v37_v12, %v35_v11  ;;  %v4442_v16 = vld [vmem:[%s5250_s1 + $0x8] sm:$0xff]   ;;  %v4443_v17 = vld [vmem:[%s5250_s1 + $0x40] sm:$0xff]   ;;  %v36_v20 = vld [vmem:[%s5249_s0 + $0x10] sm:$0xff] }
   0x7   :  { %4028 = vmatpush3.bf16.msra.mxu0 %v4432_v3  ;;  %v4444_v18 = vld [vmem:[%s5250_s1] sm:$0xff]  }
   0x8   :  { %4029 = vmatprep.subr.bf16.mxu0 %v4433_v4  ;;  %207 = vmatprep.mubr.bf16.mxu0 %v71_v14  ;;  %v34_v19 = vld [vmem:[%s5249_s0] sm:$0xff] }
   0xb   :  { %4030 = vmatpush3.bf16.msra.mxu0 %v4434_v5 }
   0xc   :  { %4031 = vmatprep.subr.bf16.mxu0 %v4435_v6 }
   0xf   :  { %4032 = vmatpush3.bf16.msra.mxu0 %v4436_v7 }
  0x10   :  { %4033 = vmatprep.subr.bf16.mxu0 %v4437_v8 }
  0x13   :  { %4034 = vmatpush3.bf16.msra.mxu0 %v4438_v9 }
  0x14   :  { %4035 = vmatprep.subr.bf16.mxu0 %v4439_v10 }
  0x17   :  { %4036 = vmatpush3.bf16.msra.mxu0 %v4440_v13 }
  0x18   :  { %4037 = vmatprep.subr.bf16.mxu0 %v4441_v15 }
  0x1b   :  { %4038 = vmatpush3.bf16.msra.mxu0 %v4442_v16 }
  0x1c   :  { %4039 = vmatprep.subr.bf16.mxu0 %v4443_v17 }
  0x1d   :  { %14 = vsyncpa [#allocation3], 0  ;;  %v70_v21 = vpack.c.bf16 %v36_v20, %v34_v19  ;;  %v4445_v22 = vld [vmem:[%s5253_s4 + $0x8] sm:$0xff]   ;;  %v4563_v23 = vmov 0.0   ;;  %v4446_v24 = vld [vmem:[%s5253_s4] sm:$0xff]   ;;  %vm4564_vm0 = vmmov 0   ;;  %v243_v40 = vlaneseq }
  0x1e   :  { %4149 = vmatprep.subr.bf16.mxu1 %v4563_v23  ;;  %4153 = vmatprep.mubr.msk.bf16.mxu1 %vm4564_vm0, %v4563_v23  ;;  %v3909_v26 = vld [vmem:[%s5251_s2] ss:$0 sm:$0xff]  ;;  %vm259_vm1 = vcmask 261120   ;;  %s4565_s13 = smov 96   ;;  %vm307_vm2 = vcmask 64512   ;;  %s4566_s14 = smov 64  }
  0x1f   :  { %4040 = vmatpush3.bf16.msra.mxu0 %v4444_v18  ;;  %4150 = vmatpush3.bf16.msra.mxu1 %v4445_v22  ;;  %v218_v35 = vld [vmem:[%s5252_s3] sm:$0xff]  ;;  %v4718_v41 = vshrl.u32 %v243_v40, 7  ;;  %s4567_s15 = smov 88   ;;  %s4568_s16 = smov 120   ;;  %vm968_vm3 = vcmask 1043456   ;;  %vm1965_vm4 = vcmask 523264  }
  0x20   :  { %4157 = vmatprep.subr.mxu0 %v4563_v23  ;;  %4151 = vmatprep.subr.bf16.mxu1 %v4563_v23  ;;  %v4724_v43 = vld [vmem:[%s5257_s8] sm:$0xff]  ;;  %s4569_s17 = smov 56   ;;  %s4570_s18 = smov 80  }
  0x21   :  { %v245_v42 = vsub.s32 0, %v4718_v41  ;;  %s4571_s19 = smov 112   ;;  %s4572_s20 = smov 72  }
  0x22   :  { %208 = vmatmul.mubr.bf16.vlgmr.msra.gmra.mxu0 %v70_v21  ;;  %s4573_s25 = smov 48   ;;  %s4574_s26 = smov 104  }
  0x23   :  { %4152 = vmatpush3.bf16.msra.mxu1 %v4446_v24  ;;  %4159 = vmatprep.mubr.msk.f32.mxu0 %vm4564_vm0, %v4563_v23  ;;  %v246_v44 = vrot.slane %v4724_v43, %v245_v42  ;;  %s4575_s27 = smov 40  }
  0x24   :  { %4162 = vmatprep.subr.mxu1 %v4563_v23 }
  0xe2   :  { %v4041_v25 = vpop.f32.mrf.mxu0 }
  0xe4   :  { %v4042_v27 = vpop.f32.mrf.mxu0 }
  0xe5   :  { %v4043_v28 = vadd.f32 %v4042_v27, %v4041_v25 }
  0xe6   :  { %v4044_v29 = vpop.f32.mrf.mxu0 }
  0xe7   :  { %v210_v30 = vadd.f32 %v4043_v28, %v3909_v26 }
  0xe8   :  { %v4045_v31 = vpop.f32.mrf.mxu0 }
  0xe9   :  { %v4046_v32 = vadd.f32 %v4045_v31, %v4044_v29  ;;  %v216_v33 = vmax.f32 %v210_v30, 0.0 }
  0xeb   :  { %v213_v34 = vadd.f32 %v4046_v32, %v3909_v26  ;;  %v4709_v37 = vadd.f32 %v218_v35, %v216_v33 }
  0xed   :  { %v217_v36 = vmax.f32 %v213_v34, 0.0 }
  0xef   :  { %v4711_v38 = vadd.f32 %v218_v35, %v217_v36 }
  0xf1   :  { %v242_v39 = vpack.c.bf16 %v4711_v38, %v4709_v37 }
  0xf3   :  { %4154 = vmatmul.mubr.msk.bf16.vlgmr.msra.gmra.mxu1 %vm259_vm1, %v242_v39 }
  0xf4   :  { %4164 = vmatprep.mubr.msk.f32.mxu1 %vm4564_vm0, %v4563_v23 }
 0x1b3   :  { %v297_v45 = vpop.f32.mrf.mxu1 }
 0x1b4   :  { %v4729_v46 = vadd.f32 %v297_v45, %v246_v44 }
 0x1b5   :  { %v4155_v47 = vpop.f32.mrf.mxu1 }
 0x1b6   :  { %305 = vrot.lane.b32.xlu0 %v4729_v46, %s4565_s13 }
 0x1b7   :  { %v300_v48 = vpop.f32.mrf.mxu1 }
 0x1b8   :  { %v4733_v49 = vadd.f32 %v300_v48, %v246_v44 }
 0x1b9   :  { %v4156_v50 = vpop.f32.mrf.mxu1 }
 0x1ba   :  { %383 = vrot.lane.b32.xlu0 %v4733_v49, %s4565_s13 }
 0x228   :  { %v306_v51 = vpop.permute.xlu0 %305 }
 0x229   :  { %4158 = vmatpush3.xpose.msk.msra.mxu0 %vm307_vm2, %v306_v51 }
 0x22a   :  { %4187 = vmatprep.subr.mxu0 %v4563_v23 }
 0x22c   :  { %4160 = vmatmul.mubr.msk.f32.vlgmr.msra.gmra.mxu0 %vm307_vm2, %v4729_v46  ;;  %v384_v52 = vpop.permute.xlu0 %383 }
 0x22d   :  { %4163 = vmatpush3.xpose.msk.msra.mxu1 %vm307_vm2, %v384_v52  ;;  %4189 = vmatprep.mubr.msk.f32.mxu0 %vm4564_vm0, %v4563_v23  ;;  %v225_v52 = vld [vmem:[%s5254_s5] sm:$0xf] }
 0x22e   :  { %4167 = vmatprep.subr.mxu1 %v4563_v23 }
 0x230   :  { %4165 = vmatmul.mubr.msk.f32.vlgmr.msra.gmra.mxu1 %vm307_vm2, %v4733_v49 }
 0x231   :  { %4169 = vmatprep.mubr.msk.f32.mxu1 %vm4564_vm0, %v4563_v23 }
 0x2ec   :  { %v378_v53 = vpop.f32.mrf.mxu0 }
 0x2ed   :  { %v459_v54 = vsel %vm307_vm2, %v378_v53, -inf }
 0x2ee   :  { %460 = vmax.xlane.f32.xlu1 %v459_v54  ;;  %v4161_v55 = vpop.f32.mrf.mxu0 }
 0x2ef   :  { %v1017_v55 = vsel %vm968_vm3, %v225_v52, 0 }
 0x2f0   :  { %v455_v56 = vpop.f32.mrf.mxu1 }
 0x2f1   :  { %v462_v57 = vsel %vm307_vm2, %v455_v56, -inf }
 0x2f2   :  { %463 = vmax.xlane.f32.xlu1 %v462_v57  ;;  %v4166_v58 = vpop.f32.mrf.mxu1 }
 0x2f3   :  { %v226_v58 = vld [vmem:[%s5254_s5 + $0x4] sm:$0xf] }
 0x303   :  { %481 = vrot.lane.b32.xlu1 %v4729_v46, %s4566_s14 }
 0x307   :  { %557 = vrot.lane.b32.xlu1 %v4733_v49, %s4566_s14 }
 0x30b   :  { %636 = vrot.lane.b32.xlu1 %v4729_v46, %s4567_s15 }
 0x30f   :  { %634 = vrot.lane.b32.xlu1 %v4729_v46, %s4568_s16 }
 0x377   :  { %v461_v59 = vpop.xlane.xlu1 %460 }
 0x378   :  { %v465_v60 = vsub.f32 %v378_v53, %v461_v59  ;;  %v970_v59 = vsel %vm968_vm3, %v226_v58, 0 }
 0x37a   :  { %v467_v61 = vmul.f32 1.442695, %v465_v60 }
 0x37b   :  { %v464_v62 = vpop.xlane.xlu1 %463 }
 0x37c   :  { %4461 = vpow2.f32 %v467_v61  ;;  %v466_v63 = vsub.f32 %v455_v56, %v464_v62 }
 0x37e   :  { %v469_v0 = vmul.f32 1.442695, %v466_v63 }
 0x37f   :  { %v482_v1 = vpop.permute.xlu1 %481 }
 0x380   :  { %4463 = vpow2.f32 %v469_v0  ;;  %4168 = vmatpush3.msra.mxu1 %v482_v1 }
 0x381   :  { %4172 = vmatprep.subr.mxu1 %v4563_v23 }
 0x383   :  { %v558_v6 = vpop.permute.xlu1 %557 }
 0x387   :  { %v637_v7 = vpop.permute.xlu1 %636 }
 0x389   :  { %v4462_v2 = vpop.eup %4461 }
 0x38a   :  { %v471_v3 = vsel %vm307_vm2, %v4462_v2, 0.0 }
 0x38b   :  { %472 = vadd.xlane.f32.xlu0 %v471_v3  ;;  %v635_v8 = vpop.permute.xlu1 %634 }
 0x38d   :  { %v4464_v4 = vpop.eup %4463 }
 0x38e   :  { %v474_v5 = vsel %vm307_vm2, %v4464_v4, 0.0 }
 0x38f   :  { %475 = vadd.xlane.f32.xlu1 %v474_v5 }
 0x3a0   :  { %712 = vrot.lane.b32.xlu1 %v4733_v49, %s4568_s16 }
 0x3a1   :  { %714 = vrot.lane.b32.xlu0 %v4733_v49, %s4567_s15 }
 0x414   :  { %v473_v9 = vpop.xlane.xlu0 %472 }
 0x415   :  { %4465 = vrcp.f32 %v473_v9 }
 0x418   :  { %v476_v10 = vpop.xlane.xlu1 %475  ;;  %v715_v15 = vpop.permute.xlu0 %714 }
 0x419   :  { %4467 = vrcp.f32 %v476_v10 }
 0x41c   :  { %v713_v16 = vpop.permute.xlu1 %712 }
 0x422   :  { %v4466_v11 = vpop.eup %4465 }
 0x423   :  { %v479_v12 = vmul.f32 %v4466_v11, %v4462_v2 }
 0x425   :  { %4170 = vmatmul.mubr.msk.f32.vlgmr.msra.gmra.mxu1 %vm307_vm2, %v479_v12 }
 0x426   :  { %v4468_v13 = vpop.eup %4467  ;;  %4173 = vmatpush3.msra.mxu1 %v558_v6  ;;  %4174 = vmatprep.mubr.msk.f32.mxu1 %vm4564_vm0, %v4563_v23 }
 0x427   :  { %4177 = vmatprep.subr.mxu1 %v4563_v23  ;;  %v480_v14 = vmul.f32 %v4468_v13, %v4464_v4 }
 0x429   :  { %4175 = vmatmul.mubr.msk.f32.vlgmr.msra.gmra.mxu1 %vm307_vm2, %v480_v14 }
 0x42a   :  { %4178 = vmatpush3.xpose.msk.msra.mxu1 %vm307_vm2, %v637_v7  ;;  %4179 = vmatprep.mubr.msk.f32.mxu1 %vm4564_vm0, %v4563_v23 }
 0x42b   :  { %4182 = vmatprep.subr.mxu1 %v4563_v23 }
 0x42d   :  { %4180 = vmatmul.mubr.msk.f32.vlgmr.msra.gmra.mxu1 %vm307_vm2, %v635_v8 }
 0x42e   :  { %4183 = vmatpush3.xpose.msk.msra.mxu1 %vm307_vm2, %v715_v15  ;;  %4184 = vmatprep.mubr.msk.f32.mxu1 %vm4564_vm0, %v4563_v23 }
 0x42f   :  { %4192 = vmatprep.subr.mxu1 %v4563_v23 }
 0x431   :  { %4185 = vmatmul.mubr.msk.f32.vlgmr.msra.gmra.mxu1 %vm307_vm2, %v713_v16 }
 0x432   :  { %4194 = vmatprep.mubr.msk.f32.mxu1 %vm4564_vm0, %v4563_v23 }
 0x4e5   :  { %v4783_v17 = vpop.f32.mrf.mxu1 }
 0x4e7   :  { %v4171_v18 = vpop.f32.mrf.mxu1 }
 0x4e9   :  { %v629_v19 = vpop.f32.mrf.mxu1 }
 0x4ea   :  { %v633_v20 = vpack.c.bf16 %v629_v19, %v4783_v17 }
 0x4eb   :  { %v4176_v21 = vpop.f32.mrf.mxu1 }
 0x4ed   :  { %v708_v22 = vpop.f32.mrf.mxu1 }
 0x4ee   :  { %v790_v24 = vsel %vm307_vm2, %v708_v22, -inf }
 0x4ef   :  { %791 = vmax.xlane.f32.xlu1 %v790_v24  ;;  %v4181_v25 = vpop.f32.mrf.mxu1 }
 0x4f1   :  { %v786_v26 = vpop.f32.mrf.mxu1 }
 0x4f2   :  { %v793_v27 = vsel %vm307_vm2, %v786_v26, -inf }
 0x4f3   :  { %794 = vmax.xlane.f32.xlu0 %v793_v27  ;;  %v4186_v28 = vpop.f32.mrf.mxu1 }
 0x509   :  { %888 = vrot.lane.b32.xlu0 %v4733_v49, %s4569_s17 }
 0x50d   :  { %1062 = vrot.lane.b32.xlu0 %v4729_v46, %s4570_s18 }
 0x578   :  { %v792_v29 = vpop.xlane.xlu1 %791 }
 0x579   :  { %v796_v30 = vsub.f32 %v708_v22, %v792_v29 }
 0x57b   :  { %v798_v31 = vmul.f32 1.442695, %v796_v30 }
 0x57c   :  { %v795_v32 = vpop.xlane.xlu0 %794 }
 0x57d   :  { %4469 = vpow2.f32 %v798_v31  ;;  %v797_v33 = vsub.f32 %v786_v26, %v795_v32 }
 0x57f   :  { %v800_v34 = vmul.f32 1.442695, %v797_v33 }
 0x580   :  { %v889_v35 = vpop.permute.xlu0 %888 }
 0x581   :  { %4471 = vpow2.f32 %v800_v34  ;;  %4193 = vmatpush3.msra.mxu1 %v889_v35 }
 0x582   :  { %4203 = vmatprep.subr.bf16.mxu1 %v4563_v23 }
 0x584   :  { %v1063_v1 = vpop.permute.xlu0 %1062 }
 0x58a   :  { %v4470_v36 = vpop.eup %4469 }
 0x58b   :  { %v802_v39 = vsel %vm307_vm2, %v4470_v36, 0.0 }
 0x58c   :  { %803 = vadd.xlane.f32.xlu1 %v802_v39 }
 0x58e   :  { %v4472_v40 = vpop.eup %4471 }
 0x58f   :  { %v805_v44 = vsel %vm307_vm2, %v4472_v40, 0.0 }
 0x590   :  { %806 = vadd.xlane.f32.xlu1 %v805_v44 }
 0x5a1   :  { %812 = vrot.lane.b32.xlu1 %v4729_v46, %s4569_s17 }
 0x5a5   :  { %1140 = vrot.lane.b32.xlu1 %v4733_v49, %s4570_s18 }
 0x5a9   :  { %1138 = vrot.lane.b32.xlu1 %v4733_v49, %s4571_s19 }
 0x5ad   :  { %1060 = vrot.lane.b32.xlu1 %v4729_v46, %s4571_s19 }
 0x5b1   :  { %1442 = vrot.lane.b32.xlu1 %v4729_v46, %s4572_s20 }
 0x615   :  { %v804_v45 = vpop.xlane.xlu1 %803 }
 0x616   :  { %4473 = vrcp.f32 %v804_v45 }
 0x619   :  { %v807_v47 = vpop.xlane.xlu1 %806 }
 0x61a   :  { %4475 = vrcp.f32 %v807_v47 }
 0x61d   :  { %v813_v48 = vpop.permute.xlu1 %812 }
 0x61e   :  { %4188 = vmatpush3.msra.mxu0 %v813_v48 }
 0x61f   :  { %4197 = vmatprep.subr.bf16.mxu0 %v4563_v23 }
 0x621   :  { %v1141_v56 = vpop.permute.xlu1 %1140 }
 0x623   :  { %v4474_v50 = vpop.eup %4473 }
 0x624   :  { %v810_v51 = vmul.f32 %v4474_v50, %v4470_v36 }
 0x625   :  { %v1139_v57 = vpop.permute.xlu1 %1138 }
 0x626   :  { %4190 = vmatmul.mubr.msk.f32.vlgmr.msra.gmra.mxu0 %vm307_vm2, %v810_v51 }
 0x627   :  { %v4476_v53 = vpop.eup %4475  ;;  %4199 = vmatprep.mubr.msk.bf16.mxu0 %vm4564_vm0, %v4563_v23  ;;  %4198 = vmatpush3.bf16.msra.mxu0 %v970_v59 }
 0x628   :  { %v811_v54 = vmul.f32 %v4476_v53, %v4472_v40  ;;  %4209 = vmatprep.subr.mxu0 %v4563_v23 }
 0x629   :  { %v1061_v5 = vpop.permute.xlu1 %1060 }
 0x62a   :  { %4195 = vmatmul.mubr.msk.f32.vlgmr.msra.gmra.mxu1 %vm307_vm2, %v811_v54 }
 0x62b   :  { %4204 = vmatpush3.bf16.msra.mxu1 %v1017_v55  ;;  %4205 = vmatprep.mubr.msk.bf16.mxu1 %vm4564_vm0, %v4563_v23  ;;  %v227_v55 = vld [vmem:[%s5254_s5 + $0x8] sm:$0xf] }
 0x62c   :  { %4214 = vmatprep.subr.mxu1 %v4563_v23 }
 0x62d   :  { %v1443_v24 = vpop.permute.xlu1 %1442 }
 0x62e   :  { %4206 = vmatmul.mubr.msk.bf16.vlgmr.msra.gmra.mxu1 %vm307_vm2, %v633_v20 }
 0x62f   :  { %4215 = vmatpush3.xpose.msk.msra.mxu1 %vm307_vm2, %v1141_v56  ;;  %4216 = vmatprep.mubr.msk.f32.mxu1 %vm4564_vm0, %v4563_v23  ;;  %v1395_v56 = vsel %vm968_vm3, %v227_v55, 0 }
 0x630   :  { %4224 = vmatprep.subr.mxu1 %v4563_v23 }
 0x636   :  { %4217 = vmatmul.mubr.msk.f32.vlgmr.msra.gmra.mxu1 %vm307_vm2, %v1139_v57 }
 0x637   :  { %4226 = vmatprep.mubr.msk.f32.mxu1 %vm4564_vm0, %v4563_v23 }
 0x6e6   :  { %v884_v60 = vpop.f32.mrf.mxu0 }
 0x6e8   :  { %v4191_v61 = vpop.f32.mrf.mxu0 }
 0x6ea   :  { %v960_v62 = vpop.f32.mrf.mxu1 }
 0x6eb   :  { %v964_v63 = vpack.c.bf16 %v960_v62, %v884_v60 }
 0x6ec   :  { %v4196_v0 = vpop.f32.mrf.mxu1 }
 0x6ed   :  { %4200 = vmatmul.mubr.msk.bf16.vlgmr.msra.gmra.mxu0 %vm307_vm2, %v964_v63 }
 0x6ee   :  { %4210 = vmatpush3.xpose.msk.msra.mxu0 %vm307_vm2, %v1063_v1  ;;  %v4832_v2 = vpop.f32.mrf.mxu1  ;;  %4211 = vmatprep.mubr.msk.f32.mxu0 %vm4564_vm0, %v4563_v23 }
 0x6ef   :  { %4219 = vmatprep.subr.mxu0 %v4563_v23 }
 0x6f0   :  { %v4207_v3 = vpop.f32.mrf.mxu1 }
 0x6f2   :  { %v4837_v4 = vpop.f32.mrf.mxu1 }
 0x6f4   :  { %v4208_v6 = vpop.f32.mrf.mxu1 }
 0x6f5   :  { %4212 = vmatmul.mubr.msk.f32.vlgmr.msra.gmra.mxu0 %vm307_vm2, %v1061_v5 }
 0x6f6   :  { %v1212_v7 = vpop.f32.mrf.mxu1  ;;  %4221 = vmatprep.mubr.msk.f32.mxu0 %vm4564_vm0, %v4563_v23 }
 0x6f7   :  { %v1219_v8 = vsel %vm307_vm2, %v1212_v7, -inf }
 0x6f8   :  { %1220 = vmax.xlane.f32.xlu0 %v1219_v8  ;;  %v4218_v9 = vpop.f32.mrf.mxu1 }
 0x70e   :  { %1314 = vrot.lane.b32.xlu0 %v4733_v49, %s4573_s25 }
 0x712   :  { %1440 = vrot.lane.b32.xlu0 %v4729_v46, %s4574_s26 }
 0x716   :  { %1518 = vrot.lane.b32.xlu0 %v4733_v49, %s4574_s26 }
 0x781   :  { %v1221_v10 = vpop.xlane.xlu0 %1220 }
 0x782   :  { %v1223_v11 = vsub.f32 %v1212_v7, %v1221_v10 }
 0x784   :  { %v1226_v12 = vmul.f32 1.442695, %v1223_v11 }
 0x785   :  { %v1315_v13 = vpop.permute.xlu0 %1314 }
 0x786   :  { %4477 = vpow2.f32 %v1226_v12  ;;  %4225 = vmatpush3.msra.mxu1 %v1315_v13 }
 0x787   :  { %4235 = vmatprep.subr.mxu1 %v4563_v23 }
 0x789   :  { %v1441_v28 = vpop.permute.xlu0 %1440 }
 0x78d   :  { %v1519_v30 = vpop.permute.xlu0 %1518 }
 0x793   :  { %v4478_v14 = vpop.eup %4477 }
 0x794   :  { %v1231_v15 = vsel %vm307_vm2, %v4478_v14, 0.0 }
 0x795   :  { %1232 = vadd.xlane.f32.xlu1 %v1231_v15 }
 0x7a6   :  { %1520 = vrot.lane.b32.xlu1 %v4733_v49, %s4572_s20 }
 0x7ad   :  { %v4853_v16 = vpop.f32.mrf.mxu0 }
 0x7af   :  { %v4201_v17 = vpop.f32.mrf.mxu0 }
 0x7b0   :  { %v1054_v17 = vadd.f32 %v4832_v2, %v4853_v16  ;;  %v1822_v2 = vsub.s32 1, %v4718_v41 }
 0x7b1   :  { %v4855_v18 = vpop.f32.mrf.mxu0 }
 0x7b2   :  { %v1823_v16 = vrot.slane %v4724_v43, %v1822_v2 }
 0x7b3   :  { %v4202_v19 = vpop.f32.mrf.mxu0 }
 0x7b5   :  { %v1134_v20 = vpop.f32.mrf.mxu0 }
 0x7b6   :  { %v1216_v22 = vsel %vm307_vm2, %v1134_v20, -inf }
 0x7b7   :  { %v4213_v21 = vpop.f32.mrf.mxu0 }
 0x7ca   :  { %1217 = vmax.xlane.f32.xlu1 %v1216_v22  ;;  %v1057_v22 = vadd.f32 %v4837_v4, %v4855_v18 }
 0x81e   :  { %v1233_v25 = vpop.xlane.xlu1 %1232 }
 0x81f   :  { %4479 = vrcp.f32 %v1233_v25 }
 0x822   :  { %v1521_v29 = vpop.permute.xlu1 %1520 }
 0x82c   :  { %v4480_v26 = vpop.eup %4479 }
 0x82d   :  { %v1237_v27 = vmul.f32 %v4480_v26, %v4478_v14  ;;  %v228_v14 = vld [vmem:[%s5254_s5 + $0xc] sm:$0xf] }
 0x82e   :  { %v1775_v15 = vsel %vm968_vm3, %v228_v14, 0 }
 0x82f   :  { %4227 = vmatmul.mubr.msk.f32.vlgmr.msra.gmra.mxu1 %vm307_vm2, %v1237_v27 }
 0x830   :  { %4236 = vmatpush3.xpose.msk.msra.mxu1 %vm307_vm2, %v1443_v24  ;;  %4237 = vmatprep.mubr.msk.f32.mxu1 %vm4564_vm0, %v4563_v23 }
 0x831   :  { %4240 = vmatprep.subr.mxu1 %v4563_v23 }
 0x833   :  { %4238 = vmatmul.mubr.msk.f32.vlgmr.msra.gmra.mxu1 %vm307_vm2, %v1441_v28 }
 0x834   :  { %4241 = vmatpush3.xpose.msk.msra.mxu1 %vm307_vm2, %v1521_v29  ;;  %4242 = vmatprep.mubr.msk.f32.mxu1 %vm4564_vm0, %v4563_v23 }
 0x835   :  { %4250 = vmatprep.subr.mxu1 %v4563_v23 }
 0x837   :  { %4243 = vmatmul.mubr.msk.f32.vlgmr.msra.gmra.mxu1 %vm307_vm2, %v1519_v30 }
 0x838   :  { %4252 = vmatprep.mubr.msk.f32.mxu1 %vm4564_vm0, %v4563_v23 }
 0x853   :  { %v1218_v31 = vpop.xlane.xlu1 %1217 }
 0x854   :  { %v1222_v32 = vsub.f32 %v1134_v20, %v1218_v31 }
 0x856   :  { %v1224_v33 = vmul.f32 1.442695, %v1222_v32 }
 0x858   :  { %4481 = vpow2.f32 %v1224_v33 }
 0x865   :  { %v4482_v34 = vpop.eup %4481 }
 0x866   :  { %v1228_v35 = vsel %vm307_vm2, %v4482_v34, 0.0 }
 0x867   :  { %1229 = vadd.xlane.f32.xlu0 %v1228_v35 }
 0x87d   :  { %1238 = vrot.lane.b32.xlu0 %v4729_v46, %s4573_s25 }
 0x881   :  { %1694 = vrot.lane.b32.xlu0 %v4733_v49, %s4575_s27 }
 0x8ef   :  { %v1386_v36 = vpop.f32.mrf.mxu1 }
 0x8f0   :  { %v1230_v39 = vpop.xlane.xlu0 %1229 }
 0x8f1   :  { %4483 = vrcp.f32 %v1230_v39  ;;  %v4228_v40 = vpop.f32.mrf.mxu1 }
 0x8f3   :  { %v1514_v44 = vpop.f32.mrf.mxu1 }
 0x8f4   :  { %v1239_v45 = vpop.permute.xlu0 %1238  ;;  %v1596_v47 = vsel %vm307_vm2, %v1514_v44, -inf }
 0x8f5   :  { %4220 = vmatpush3.msra.mxu0 %v1239_v45  ;;  %1597 = vmax.xlane.f32.xlu1 %v1596_v47  ;;  %v4239_v48 = vpop.f32.mrf.mxu1 }
 0x8f6   :  { %4229 = vmatprep.subr.bf16.mxu0 %v4563_v23 }
 0x8f7   :  { %v1592_v50 = vpop.f32.mrf.mxu1 }
 0x8f8   :  { %v1695_v51 = vpop.permute.xlu0 %1694  ;;  %v1599_v52 = vsel %vm307_vm2, %v1592_v50, -inf }
 0x8f9   :  { %4251 = vmatpush3.msra.mxu1 %v1695_v51  ;;  %1600 = vmax.xlane.f32.xlu1 %v1599_v52  ;;  %v4244_v49 = vpop.f32.mrf.mxu1 }
 0x8fa   :  { %4261 = vmatprep.subr.bf16.mxu1 %v4563_v23  ;;  %v4448_v49 = vld [vmem:[%s5255_s6] sm:$0xff]  }
 0x8fe   :  { %v4484_v53 = vpop.eup %4483 }
 0x8ff   :  { %v1236_v54 = vmul.f32 %v4484_v53, %v4482_v34 }
 0x901   :  { %4222 = vmatmul.mubr.msk.f32.vlgmr.msra.gmra.mxu0 %vm307_vm2, %v1236_v54 }
 0x902   :  { %4231 = vmatprep.mubr.msk.bf16.mxu0 %vm4564_vm0, %v4563_v23  ;;  %4230 = vmatpush3.bf16.msra.mxu0 %v1395_v56 }
 0x903   :  { %4245 = vmatprep.subr.mxu0 %v4563_v23 }
 0x97e   :  { %v1598_v57 = vpop.xlane.xlu1 %1597 }
 0x97f   :  { %v1602_v58 = vsub.f32 %v1514_v44, %v1598_v57 }
 0x981   :  { %v1604_v59 = vmul.f32 1.442695, %v1602_v58 }
 0x982   :  { %v1601_v60 = vpop.xlane.xlu1 %1600 }
 0x983   :  { %4485 = vpow2.f32 %v1604_v59  ;;  %v1603_v61 = vsub.f32 %v1592_v50, %v1601_v60 }
 0x985   :  { %v1606_v62 = vmul.f32 1.442695, %v1603_v61 }
 0x987   :  { %4487 = vpow2.f32 %v1606_v62 }
 0x990   :  { %v4486_v63 = vpop.eup %4485 }
 0x991   :  { %v1608_v0 = vsel %vm307_vm2, %v4486_v63, 0.0 }
 0x992   :  { %1609 = vadd.xlane.f32.xlu1 %v1608_v0 }
 0x994   :  { %v4488_v1 = vpop.eup %4487 }
 0x995   :  { %v1611_v3 = vsel %vm307_vm2, %v4488_v1, 0.0 }
 0x996   :  { %1612 = vadd.xlane.f32.xlu1 %v1611_v3 }
 0x9a7   :  { %1618 = vrot.lane.b32.xlu1 %v4729_v46, %s4575_s27 }
 0x9c1   :  { %v1310_v5 = vpop.f32.mrf.mxu0 }
 0x9c2   :  { %v1390_v6 = vpack.c.bf16 %v1386_v36, %v1310_v5 }
 0x9c3   :  { %v4223_v7 = vpop.f32.mrf.mxu0 }
 0x9c4   :  { %4232 = vmatmul.mubr.msk.bf16.vlgmr.msra.gmra.mxu0 %vm307_vm2, %v1390_v6  ;;  %v1863_v7 = vsub.s32 4, %v4718_v41 }
 0x9c5   :  { %4247 = vmatprep.mubr.msk.f32.mxu0 %vm4564_vm0, %v4563_v23 }
 0xa1b   :  { %v1610_v8 = vpop.xlane.xlu1 %1609 }
 0xa1c   :  { %4489 = vrcp.f32 %v1610_v8 }
 0xa1f   :  { %v1613_v9 = vpop.xlane.xlu1 %1612 }
 0xa20   :  { %4491 = vrcp.f32 %v1613_v9 }
 0xa23   :  { %v1619_v10 = vpop.permute.xlu1 %1618 }
 0xa24   :  { %4246 = vmatpush3.msra.mxu0 %v1619_v10 }
 0xa25   :  { %4255 = vmatprep.subr.bf16.mxu0 %v4563_v23 }
 0xa29   :  { %v4490_v11 = vpop.eup %4489 }
 0xa2a   :  { %v1616_v12 = vmul.f32 %v4490_v11, %v4486_v63  ;;  %v1864_v11 = vrot.slane %v4724_v43, %v1863_v7 }
 0xa2c   :  { %4248 = vmatmul.mubr.msk.f32.vlgmr.msra.gmra.mxu0 %vm307_vm2, %v1616_v12  ;;  %v1869_v12 = vsub.s32 5, %v4718_v41 }
 0xa2d   :  { %v4492_v46 = vpop.eup %4491  ;;  %4257 = vmatprep.mubr.msk.bf16.mxu0 %vm4564_vm0, %v4563_v23  ;;  %4256 = vmatpush3.bf16.msra.mxu0 %v1775_v15 }
 0xa2e   :  { %v1617_v13 = vmul.f32 %v4492_v46, %v4488_v1  ;;  %4269 = vmatprep.subr.bf16.mxu0 %v4563_v23 }
 0xa30   :  { %4253 = vmatmul.mubr.msk.f32.vlgmr.msra.gmra.mxu1 %vm307_vm2, %v1617_v13 }
 0xa31   :  { %4265 = vmatprep.mubr.msk.bf16.mxu1 %vm4564_vm0, %v4563_v23 }
 0xa84   :  { %v1431_v19 = vpop.f32.mrf.mxu0 }
 0xa85   :  { %v1438_v20 = vadd.f32 %v1431_v19, %v1054_v17  ;;  %v1870_v17 = vrot.slane %v4724_v43, %v1869_v12 }
 0xa86   :  { %v4233_v21 = vpop.f32.mrf.mxu0 }
 0xa88   :  { %v1434_v24 = vpop.f32.mrf.mxu0 }
 0xa89   :  { %v1439_v25 = vadd.f32 %v1434_v24, %v1057_v22  ;;  %v4450_v24 = vld [vmem:[%s5256_s7 + $0x10] sm:$0xff]  }
 0xa8a   :  { %v4234_v26 = vpop.f32.mrf.mxu0 }
 0xa8b   :  { %v4452_v26 = vld [vmem:[%s5256_s7] sm:$0xff]  }
 0xaec   :  { %v1690_v27 = vpop.f32.mrf.mxu0 }
 0xaee   :  { %v4249_v28 = vpop.f32.mrf.mxu0 }
 0xaf0   :  { %v1766_v29 = vpop.f32.mrf.mxu1 }
 0xaf1   :  { %v1770_v30 = vpack.c.bf16 %v1766_v29, %v1690_v27  ;;  %v1876_v27 = vsub.s32 2, %v4718_v41 }
 0xaf2   :  { %v4254_v31 = vpop.f32.mrf.mxu1 }
 0xaf3   :  { %4258 = vmatmul.mubr.msk.bf16.vlgmr.msra.gmra.mxu0 %vm307_vm2, %v1770_v30  ;;  %v1877_v28 = vrot.slane %v4724_v43, %v1876_v27 }
 0xaf4   :  { %4277 = vmatprep.mubr.msk.bf16.mxu0 %vm4564_vm0, %v4563_v23 }
 0xbb3   :  { %v1811_v4 = vpop.f32.mrf.mxu0 }
 0xbb4   :  { %v1818_v18 = vadd.f32 %v1811_v4, %v1438_v20 }
 0xbb5   :  { %v4259_v32 = vpop.f32.mrf.mxu0 }
 0xbb6   :  { %v1824_v33 = vadd.f32 %v1823_v16, %v1818_v18 }
 0xbb7   :  { %v1814_v34 = vpop.f32.mrf.mxu0 }
 0xbb8   :  { %v1826_v35 = vadd.f32 %v1824_v33, %v4709_v37  ;;  %v1819_v36 = vadd.f32 %v1814_v34, %v1439_v25  ;;  %v4447_v37 = vld [vmem:[%s5255_s6 + $0x8] sm:$0xff]  }
 0xbb9   :  { %v4260_v39 = vpop.f32.mrf.mxu0  ;;  %4262 = vmatpush3.bf16.msra.mxu1 %v4447_v37  ;;  %v4451_v25 = vld [vmem:[%s5256_s7 + $0x8] sm:$0xff]  }
 0xbba   :  { %v1825_v40 = vadd.f32 %v1823_v16, %v1819_v36  ;;  %v1828_v44 = vsel %vm259_vm1, %v1826_v35, 0.0  ;;  %v1837_v45 = vmul.f32 %v1826_v35, %v1826_v35  ;;  %4263 = vmatprep.subr.bf16.mxu1 %v4563_v23 }
 0xbbb   :  { %1829 = vadd.xlane.f32.xlu0 %v1828_v44 }
 0xbbc   :  { %v1827_v47 = vadd.f32 %v1825_v40, %v4711_v38  ;;  %v1839_v48 = vsel %vm259_vm1, %v1837_v45, 0.0  ;;  %v4449_v38 = vld [vmem:[%s5256_s7 + $0x18] sm:$0xff]  }
 0xbbd   :  { %4264 = vmatpush3.bf16.msra.mxu1 %v4448_v49  ;;  %4270 = vmatpush3.bf16.msra.mxu0 %v4449_v38 }
 0xbbe   :  { %v1831_v50 = vsel %vm259_vm1, %v1827_v47, 0.0  ;;  %v1838_v51 = vmul.f32 %v1827_v47, %v1827_v47  ;;  %4281 = vmatprep.subr.bf16.mxu1 %v4563_v23  ;;  %4271 = vmatprep.subr.bf16.mxu0 %v4563_v23 }
 0xbbf   :  { %1840 = vadd.xlane.f32.xlu0 %v1839_v48  ;;  %1832 = vadd.xlane.f32.xlu1 %v1831_v50 }
 0xbc0   :  { %v1842_v52 = vsel %vm259_vm1, %v1838_v51, 0.0 }
 0xbc1   :  { %4272 = vmatpush3.bf16.msra.mxu0 %v4450_v24 }
 0xbc2   :  { %4273 = vmatprep.subr.bf16.mxu0 %v4563_v23 }
 0xbc3   :  { %1843 = vadd.xlane.f32.xlu0 %v1842_v52 }
 0xbc5   :  { %4274 = vmatpush3.bf16.msra.mxu0 %v4451_v25 }
 0xbc6   :  { %4275 = vmatprep.subr.bf16.mxu0 %v4563_v23 }
 0xbc9   :  { %4276 = vmatpush3.bf16.msra.mxu0 %v4452_v26 }
 0xbca   :  { %4294 = vmatprep.subr.mxu0 %v4563_v23 }
 0xc44   :  { %v1830_v53 = vpop.xlane.xlu0 %1829 }
 0xc45   :  { %v1835_v54 = vmul.f32 0.03125, %v1830_v53 }
 0xc47   :  { %v1847_v57 = vmul.f32 %v1835_v54, %v1835_v54  ;;  %v1853_v8 = vsub.f32 %v1826_v35, %v1835_v54  ;;  %v1939_v35 = vsub.s32 3, %v4718_v41 }
 0xc48   :  { %v1841_v55 = vpop.xlane.xlu0 %1840  ;;  %v1833_v56 = vpop.xlane.xlu1 %1832 }
 0xc49   :  { %v1845_v58 = vmul.f32 0.03125, %v1841_v55  ;;  %v1836_v59 = vmul.f32 0.03125, %v1833_v56  ;;  %v1940_v36 = vrot.slane %v4724_v43, %v1939_v35  ;;  %v4453_v55 = vld [vmem:[%s5253_s4 + $0x18] sm:$0xff]   ;;  %v4454_v56 = vld [vmem:[%s5253_s4 + $0x10] sm:$0xff]  }
 0xc4b   :  { %v1849_v60 = vsub.f32 %v1845_v58, %v1847_v57  ;;  %v1848_v63 = vmul.f32 %v1836_v59, %v1836_v59  ;;  %v1854_v46 = vsub.f32 %v1827_v47, %v1836_v59 }
 0xc4c   :  { %v1844_v61 = vpop.xlane.xlu0 %1843 }
 0xc4d   :  { %v1851_v62 = vmax.f32 %v1849_v60, 0.0  ;;  %v1846_v0 = vmul.f32 0.03125, %v1844_v61 }
 0xc4f   :  { %v1855_v1 = vadd.f32 1e-05, %v1851_v62  ;;  %v1850_v3 = vsub.f32 %v1846_v0, %v1848_v63 }
 0xc51   :  { %4493 = vrsqrt.f32 %v1855_v1  ;;  %v1852_v5 = vmax.f32 %v1850_v3, 0.0 }
 0xc53   :  { %v1856_v6 = vadd.f32 1e-05, %v1852_v5 }
 0xc55   :  { %4495 = vrsqrt.f32 %v1856_v6 }
 0xc5e   :  { %v4494_v9 = vpop.eup %4493 }
 0xc5f   :  { %v1859_v10 = vmul.f32 %v4494_v9, %v1853_v8 }
 0xc61   :  { %v1865_v15 = vmul.f32 %v1864_v11, %v1859_v10 }
 0xc62   :  { %v4496_v13 = vpop.eup %4495 }
 0xc63   :  { %v1860_v14 = vmul.f32 %v4496_v13, %v1854_v46  ;;  %v1871_v20 = vadd.f32 %v1870_v17, %v1865_v15  ;;  %v2046_v46 = vsub.s32 6, %v4718_v41 }
 0xc65   :  { %v1866_v19 = vmul.f32 %v1864_v11, %v1860_v14 }
 0xc67   :  { %v1872_v21 = vadd.f32 %v1870_v17, %v1866_v19  ;;  %v2047_v17 = vrot.slane %v4724_v43, %v2046_v46  ;;  %v2052_v19 = vsub.s32 7, %v4718_v41 }
 0xc69   :  { %v1873_v22 = vpack.c.bf16 %v1872_v21, %v1871_v20  ;;  %v2053_v25 = vrot.slane %v4724_v43, %v2052_v19 }
 0xc6b   :  { %4266 = vmatmul.mubr.msk.bf16.vlgmr.msra.gmra.mxu1 %vm259_vm1, %v1873_v22 }
 0xc6c   :  { %4285 = vmatprep.mubr.msk.bf16.mxu1 %vm4564_vm0, %v4563_v23  ;;  %4282 = vmatpush3.bf16.msra.mxu1 %v4453_v55 }
 0xc6d   :  { %4283 = vmatprep.subr.bf16.mxu1 %v4563_v23 }
 0xc70   :  { %4284 = vmatpush3.bf16.msra.mxu1 %v4454_v56 }
 0xc71   :  { %4289 = vmatprep.subr.mxu1 %v4563_v23 }
 0xd2b   :  { %v1927_v29 = vpop.f32.mrf.mxu1 }
 0xd2c   :  { %v1928_v31 = vadd.f32 %v1927_v29, %v1877_v28 }
 0xd2d   :  { %v4267_v30 = vpop.f32.mrf.mxu1 }
 0xd2e   :  { %v1934_v32 = vmax.f32 %v1928_v31, 0.0  ;;  %v5002_v31 = vld [vmem:[%s5257_s8 + $0x8] sm:$0xff] }
 0xd2f   :  { %v1930_v16 = vpop.f32.mrf.mxu1  ;;  %v2086_v43 = vrot.slane %v5002_v31, %v245_v42 }
 0xd30   :  { %v1931_v4 = vadd.f32 %v1930_v16, %v1877_v28 }
 0xd31   :  { %v4268_v18 = vpop.f32.mrf.mxu1 }
 0xd32   :  { %v1935_v33 = vmax.f32 %v1931_v4, 0.0 }
 0xd34   :  { %v1936_v34 = vpack.c.bf16 %v1935_v33, %v1934_v32 }
 0xd36   :  { %4278 = vmatmul.mubr.msk.bf16.vlgmr.msra.gmra.mxu0 %vm1965_vm4, %v1936_v34 }
 0xd37   :  { %4296 = vmatprep.mubr.msk.f32.mxu0 %vm4564_vm0, %v4563_v23 }
 0xdf6   :  { %v2003_v39 = vpop.f32.mrf.mxu0 }
 0xdf7   :  { %v2004_v40 = vadd.f32 %v2003_v39, %v1940_v36 }
 0xdf8   :  { %v4279_v44 = vpop.f32.mrf.mxu0 }
 0xdf9   :  { %v2010_v45 = vadd.f32 %v2004_v40, %v1871_v20 }
 0xdfa   :  { %v2006_v47 = vpop.f32.mrf.mxu0 }
 0xdfb   :  { %v2007_v48 = vadd.f32 %v2006_v47, %v1940_v36  ;;  %v2012_v50 = vsel %vm259_vm1, %v2010_v45, 0.0  ;;  %v2020_v51 = vmul.f32 %v2010_v45, %v2010_v45 }
 0xdfc   :  { %2013 = vadd.xlane.f32.xlu0 %v2012_v50  ;;  %v4280_v52 = vpop.f32.mrf.mxu0 }
 0xdfd   :  { %v2011_v37 = vadd.f32 %v2007_v48, %v1872_v21  ;;  %v2022_v49 = vsel %vm259_vm1, %v2020_v51, 0.0 }
 0xdfe   :  { %2023 = vadd.xlane.f32.xlu1 %v2022_v49 }
 0xdff   :  { %v2015_v38 = vsel %vm259_vm1, %v2011_v37, 0.0  ;;  %v2021_v53 = vmul.f32 %v2011_v37, %v2011_v37 }
 0xe00   :  { %2016 = vadd.xlane.f32.xlu0 %v2015_v38 }
 0xe01   :  { %v2025_v54 = vsel %vm259_vm1, %v2021_v53, 0.0 }
 0xe04   :  { %2026 = vadd.xlane.f32.xlu0 %v2025_v54 }
 0xe85   :  { %v2014_v57 = vpop.xlane.xlu0 %2013 }
 0xe86   :  { %v2018_v58 = vmul.f32 0.03125, %v2014_v57 }
 0xe87   :  { %v2024_v59 = vpop.xlane.xlu1 %2023 }
 0xe88   :  { %v2030_v60 = vmul.f32 %v2018_v58, %v2018_v58  ;;  %v2028_v61 = vmul.f32 0.03125, %v2024_v59  ;;  %v2036_v14 = vsub.f32 %v2010_v45, %v2018_v58 }
 0xe89   :  { %v2017_v62 = vpop.xlane.xlu0 %2016 }
 0xe8a   :  { %v2032_v63 = vsub.f32 %v2028_v61, %v2030_v60  ;;  %v2019_v0 = vmul.f32 0.03125, %v2017_v62 }
 0xe8c   :  { %v2034_v1 = vmax.f32 %v2032_v63, 0.0  ;;  %v2031_v6 = vmul.f32 %v2019_v0, %v2019_v0  ;;  %v2037_v20 = vsub.f32 %v2011_v37, %v2019_v0 }
 0xe8d   :  { %v2027_v3 = vpop.xlane.xlu0 %2026 }
 0xe8e   :  { %v2038_v5 = vadd.f32 1e-05, %v2034_v1  ;;  %v2029_v8 = vmul.f32 0.03125, %v2027_v3 }
 0xe90   :  { %4497 = vrsqrt.f32 %v2038_v5  ;;  %v2033_v9 = vsub.f32 %v2029_v8, %v2031_v6 }
 0xe92   :  { %v2035_v10 = vmax.f32 %v2033_v9, 0.0 }
 0xe94   :  { %v2039_v11 = vadd.f32 1e-05, %v2035_v10 }
 0xe96   :  { %4499 = vrsqrt.f32 %v2039_v11 }
 0xe9d   :  { %v4498_v13 = vpop.eup %4497 }
 0xe9e   :  { %v2042_v15 = vmul.f32 %v4498_v13, %v2036_v14 }
 0xea0   :  { %v2048_v24 = vmul.f32 %v2047_v17, %v2042_v15 }
 0xea2   :  { %v4990_v28 = vadd.f32 %v2053_v25, %v2048_v24 }
 0xea3   :  { %v4500_v21 = vpop.eup %4499 }
 0xea4   :  { %v2043_v22 = vmul.f32 %v4500_v21, %v2037_v20 }
 0xea6   :  { %v2049_v26 = vmul.f32 %v2047_v17, %v2043_v22 }
 0xea8   :  { %v4992_v29 = vadd.f32 %v2053_v25, %v2049_v26 }
 0xeaa   :  { %v2082_v30 = vpack.c.bf16 %v4992_v29, %v4990_v28 }
 0xeac   :  { %4286 = vmatmul.mubr.msk.bf16.vlgmr.msra.gmra.mxu1 %vm259_vm1, %v2082_v30 }
 0xead   :  { %4291 = vmatprep.mubr.msk.f32.mxu1 %vm4564_vm0, %v4563_v23 }
 0xf6c   :  { %v2136_v16 = vpop.f32.mrf.mxu1 }
 0xf6d   :  { %v5007_v4 = vadd.f32 %v2136_v16, %v2086_v43 }
 0xf6e   :  { %v4287_v18 = vpop.f32.mrf.mxu1 }
 0xf6f   :  { %2144 = vrot.lane.b32.xlu1 %v5007_v4, %s4565_s13 }
 0xf70   :  { %v2139_v32 = vpop.f32.mrf.mxu1 }
 0xf71   :  { %v5011_v33 = vadd.f32 %v2139_v32, %v2086_v43 }
 0xf72   :  { %v4288_v34 = vpop.f32.mrf.mxu1 }
 0xf73   :  { %2221 = vrot.lane.b32.xlu0 %v5011_v33, %s4565_s13 }
 0xfe1   :  { %v2145_v36 = vpop.permute.xlu1 %2144 }
 0xfe2   :  { %4290 = vmatpush3.xpose.msk.msra.mxu1 %vm307_vm2, %v2145_v36 }
 0xfe3   :  { %4299 = vmatprep.subr.mxu1 %v4563_v23 }
 0xfe5   :  { %4292 = vmatmul.mubr.msk.f32.vlgmr.msra.gmra.mxu1 %vm307_vm2, %v5007_v4  ;;  %v2222_v42 = vpop.permute.xlu0 %2221 }
 0xfe6   :  { %4295 = vmatpush3.xpose.msk.msra.mxu0 %vm307_vm2, %v2222_v42  ;;  %4301 = vmatprep.mubr.msk.f32.mxu1 %vm4564_vm0, %v4563_v23 }
 0xfe7   :  { %4304 = vmatprep.subr.mxu0 %v4563_v23 }
 0xfe9   :  { %4297 = vmatmul.mubr.msk.f32.vlgmr.msra.gmra.mxu0 %vm307_vm2, %v5011_v33 }
 0xfea   :  { %4306 = vmatprep.mubr.msk.f32.mxu0 %vm4564_vm0, %v4563_v23 }
0x10a5   :  { %v2216_v39 = vpop.f32.mrf.mxu1 }
0x10a6   :  { %v2297_v40 = vsel %vm307_vm2, %v2216_v39, -inf }
0x10a7   :  { %2298 = vmax.xlane.f32.xlu1 %v2297_v40  ;;  %v4293_v44 = vpop.f32.mrf.mxu1 }
0x10a9   :  { %v2293_v45 = vpop.f32.mrf.mxu0 }
0x10aa   :  { %v2300_v47 = vsel %vm307_vm2, %v2293_v45, -inf }
0x10ab   :  { %2301 = vmax.xlane.f32.xlu0 %v2300_v47  ;;  %v4298_v48 = vpop.f32.mrf.mxu0 }
0x10ac   :  { %v3969_v48 = vld [vmem:[%s5254_s5 + $0x10] sm:$0xf] }
0x10b8   :  { %2319 = vrot.lane.b32.xlu1 %v5007_v4, %s4566_s14 }
0x1130   :  { %v2299_v50 = vpop.xlane.xlu1 %2298 }
0x1131   :  { %v2303_v51 = vsub.f32 %v2216_v39, %v2299_v50 }
0x1133   :  { %v2305_v52 = vmul.f32 1.442695, %v2303_v51 }
0x1134   :  { %v2302_v37 = vpop.xlane.xlu0 %2301  ;;  %v2320_v49 = vpop.permute.xlu1 %2319 }
0x1135   :  { %4501 = vpow2.f32 %v2305_v52  ;;  %v2304_v38 = vsub.f32 %v2293_v45, %v2302_v37  ;;  %4300 = vmatpush3.msra.mxu1 %v2320_v49  ;;  %v2854_v52 = vsel %vm968_vm3, %v3969_v48, 0 }
0x1136   :  { %4309 = vmatprep.subr.mxu1 %v4563_v23 }
0x1137   :  { %v2307_v53 = vmul.f32 1.442695, %v2304_v38  ;;  %v3970_v38 = vld [vmem:[%s5254_s5 + $0x14] sm:$0xf] }
0x1139   :  { %4503 = vpow2.f32 %v2307_v53  ;;  %v2807_v53 = vsel %vm968_vm3, %v3970_v38, 0 }
0x1142   :  { %v4502_v54 = vpop.eup %4501 }
0x1143   :  { %v2309_v55 = vsel %vm307_vm2, %v4502_v54, 0.0 }
0x1144   :  { %2310 = vadd.xlane.f32.xlu1 %v2309_v55 }
0x1146   :  { %v4504_v56 = vpop.eup %4503 }
0x1147   :  { %v2312_v57 = vsel %vm307_vm2, %v4504_v56, 0.0 }
0x1148   :  { %2313 = vadd.xlane.f32.xlu0 %v2312_v57 }
0x1155   :  { %2474 = vrot.lane.b32.xlu1 %v5007_v4, %s4567_s15 }
0x1159   :  { %2552 = vrot.lane.b32.xlu1 %v5011_v33, %s4567_s15 }
0x115d   :  { %2550 = vrot.lane.b32.xlu1 %v5011_v33, %s4568_s16 }
0x115e   :  { %2395 = vrot.lane.b32.xlu0 %v5011_v33, %s4566_s14 }
0x1162   :  { %2472 = vrot.lane.b32.xlu0 %v5007_v4, %s4568_s16 }
0x11cd   :  { %v2311_v58 = vpop.xlane.xlu1 %2310 }
0x11ce   :  { %4505 = vrcp.f32 %v2311_v58 }
0x11d1   :  { %v2314_v59 = vpop.xlane.xlu0 %2313  ;;  %v2475_v61 = vpop.permute.xlu1 %2474 }
0x11d2   :  { %4507 = vrcp.f32 %v2314_v59 }
0x11d5   :  { %v2396_v60 = vpop.permute.xlu0 %2395  ;;  %v2553_v1 = vpop.permute.xlu1 %2552 }
0x11d6   :  { %4305 = vmatpush3.msra.mxu0 %v2396_v60 }
0x11d7   :  { %4314 = vmatprep.subr.mxu0 %v4563_v23 }
0x11d9   :  { %v2473_v5 = vpop.permute.xlu0 %2472  ;;  %v2551_v6 = vpop.permute.xlu1 %2550 }
0x11db   :  { %v4506_v62 = vpop.eup %4505 }
0x11dc   :  { %v2317_v63 = vmul.f32 %v4506_v62, %v4502_v54 }
0x11de   :  { %4302 = vmatmul.mubr.msk.f32.vlgmr.msra.gmra.mxu1 %vm307_vm2, %v2317_v63 }
0x11df   :  { %v4508_v0 = vpop.eup %4507  ;;  %4310 = vmatpush3.xpose.msk.msra.mxu1 %vm307_vm2, %v2475_v61  ;;  %4311 = vmatprep.mubr.msk.f32.mxu1 %vm4564_vm0, %v4563_v23 }
0x11e0   :  { %v2318_v3 = vmul.f32 %v4508_v0, %v4504_v56  ;;  %4319 = vmatprep.subr.mxu1 %v4563_v23 }
0x11e2   :  { %4307 = vmatmul.mubr.msk.f32.vlgmr.msra.gmra.mxu0 %vm307_vm2, %v2318_v3  ;;  %4312 = vmatmul.mubr.msk.f32.vlgmr.msra.gmra.mxu1 %vm307_vm2, %v2473_v5 }
0x11e3   :  { %4315 = vmatpush3.xpose.msk.msra.mxu0 %vm307_vm2, %v2553_v1  ;;  %4316 = vmatprep.mubr.msk.f32.mxu0 %vm4564_vm0, %v4563_v23 }
0x11e4   :  { %4324 = vmatprep.subr.mxu0 %v4563_v23  ;;  %4321 = vmatprep.mubr.msk.f32.mxu1 %vm4564_vm0, %v4563_v23 }
0x11e6   :  { %4317 = vmatmul.mubr.msk.f32.vlgmr.msra.gmra.mxu0 %vm307_vm2, %v2551_v6 }
0x11e7   :  { %4326 = vmatprep.mubr.msk.f32.mxu0 %vm4564_vm0, %v4563_v23 }
0x129e   :  { %v2391_v8 = vpop.f32.mrf.mxu1 }
0x12a0   :  { %v4303_v9 = vpop.f32.mrf.mxu1 }
0x12a2   :  { %v2467_v10 = vpop.f32.mrf.mxu0  ;;  %v2546_v11 = vpop.f32.mrf.mxu1 }
0x12a3   :  { %v2471_v13 = vpack.c.bf16 %v2467_v10, %v2391_v8  ;;  %v2628_v14 = vsel %vm307_vm2, %v2546_v11, -inf }
0x12a4   :  { %v4308_v15 = vpop.f32.mrf.mxu0  ;;  %2629 = vmax.xlane.f32.xlu0 %v2628_v14  ;;  %v4313_v17 = vpop.f32.mrf.mxu1 }
0x12a6   :  { %v2624_v20 = vpop.f32.mrf.mxu0 }
0x12a7   :  { %v2631_v21 = vsel %vm307_vm2, %v2624_v20, -inf }
0x12a8   :  { %2632 = vmax.xlane.f32.xlu1 %v2631_v21  ;;  %v4318_v22 = vpop.f32.mrf.mxu0 }
0x12b9   :  { %2650 = vrot.lane.b32.xlu1 %v5007_v4, %s4569_s17 }
0x12bd   :  { %2977 = vrot.lane.b32.xlu1 %v5011_v33, %s4570_s18 }
0x12c1   :  { %2975 = vrot.lane.b32.xlu1 %v5011_v33, %s4571_s19 }
0x12c5   :  { %2897 = vrot.lane.b32.xlu1 %v5007_v4, %s4571_s19 }
0x12c9   :  { %3279 = vrot.lane.b32.xlu1 %v5007_v4, %s4572_s20 }
0x132d   :  { %v2630_v24 = vpop.xlane.xlu0 %2629 }
0x132e   :  { %v2634_v25 = vsub.f32 %v2546_v11, %v2630_v24 }
0x1330   :  { %v2636_v26 = vmul.f32 1.442695, %v2634_v25 }
0x1331   :  { %v2633_v30 = vpop.xlane.xlu1 %2632 }
0x1332   :  { %4509 = vpow2.f32 %v2636_v26  ;;  %v2635_v43 = vsub.f32 %v2624_v20, %v2633_v30 }
0x1334   :  { %v2638_v16 = vmul.f32 1.442695, %v2635_v43 }
0x1335   :  { %v2651_v18 = vpop.permute.xlu1 %2650 }
0x1336   :  { %4511 = vpow2.f32 %v2638_v16  ;;  %4320 = vmatpush3.msra.mxu1 %v2651_v18 }
0x1337   :  { %4329 = vmatprep.subr.bf16.mxu1 %v4563_v23 }
0x1339   :  { %v2978_v37 = vpop.permute.xlu1 %2977 }
0x133d   :  { %v2976_v49 = vpop.permute.xlu1 %2975 }
0x133f   :  { %v4510_v32 = vpop.eup %4509 }
0x1340   :  { %v2640_v34 = vsel %vm307_vm2, %v4510_v32, 0.0 }
0x1341   :  { %2641 = vadd.xlane.f32.xlu0 %v2640_v34  ;;  %v2898_v63 = vpop.permute.xlu1 %2897 }
0x1343   :  { %v4512_v36 = vpop.eup %4511 }
0x1344   :  { %v2643_v42 = vsel %vm307_vm2, %v4512_v36, 0.0 }
0x1345   :  { %2644 = vadd.xlane.f32.xlu0 %v2643_v42  ;;  %v3280_v25 = vpop.permute.xlu1 %3279 }
0x135b   :  { %2726 = vrot.lane.b32.xlu0 %v5011_v33, %s4569_s17 }
0x135f   :  { %2899 = vrot.lane.b32.xlu0 %v5007_v4, %s4570_s18 }
0x13ca   :  { %v2642_v39 = vpop.xlane.xlu0 %2641 }
0x13cb   :  { %4513 = vrcp.f32 %v2642_v39 }
0x13ce   :  { %v2645_v40 = vpop.xlane.xlu0 %2644 }
0x13cf   :  { %4515 = vrcp.f32 %v2645_v40 }
0x13d2   :  { %v2727_v44 = vpop.permute.xlu0 %2726 }
0x13d3   :  { %4325 = vmatpush3.msra.mxu0 %v2727_v44 }
0x13d4   :  { %4335 = vmatprep.subr.bf16.mxu0 %v4563_v23 }
0x13d6   :  { %v2900_v59 = vpop.permute.xlu0 %2899 }
0x13d8   :  { %v4514_v45 = vpop.eup %4513 }
0x13d9   :  { %v2648_v47 = vmul.f32 %v4514_v45, %v4510_v32 }
0x13db   :  { %4322 = vmatmul.mubr.msk.f32.vlgmr.msra.gmra.mxu1 %vm307_vm2, %v2648_v47 }
0x13dc   :  { %v4516_v50 = vpop.eup %4515  ;;  %4331 = vmatprep.mubr.msk.bf16.mxu1 %vm4564_vm0, %v4563_v23  ;;  %4330 = vmatpush3.bf16.msra.mxu1 %v2807_v53 }
0x13dd   :  { %v2649_v51 = vmul.f32 %v4516_v50, %v4512_v36  ;;  %4341 = vmatprep.subr.mxu1 %v4563_v23 }
0x13df   :  { %4327 = vmatmul.mubr.msk.f32.vlgmr.msra.gmra.mxu0 %vm307_vm2, %v2649_v51 }
0x13e0   :  { %4336 = vmatpush3.bf16.msra.mxu0 %v2854_v52  ;;  %4337 = vmatprep.mubr.msk.bf16.mxu0 %vm4564_vm0, %v4563_v23 }
0x13e1   :  { %4346 = vmatprep.subr.mxu0 %v4563_v23 }
0x13e3   :  { %4338 = vmatmul.mubr.msk.bf16.vlgmr.msra.gmra.mxu0 %vm307_vm2, %v2471_v13 }
0x13e4   :  { %4347 = vmatpush3.xpose.msk.msra.mxu0 %vm307_vm2, %v2978_v37  ;;  %4348 = vmatprep.mubr.msk.f32.mxu0 %vm4564_vm0, %v4563_v23 }
0x13e5   :  { %4356 = vmatprep.subr.mxu0 %v4563_v23 }
0x13eb   :  { %4349 = vmatmul.mubr.msk.f32.vlgmr.msra.gmra.mxu0 %vm307_vm2, %v2976_v49 }
0x13ec   :  { %4358 = vmatprep.mubr.msk.f32.mxu0 %vm4564_vm0, %v4563_v23 }
0x149b   :  { %v2722_v54 = vpop.f32.mrf.mxu1 }
0x149d   :  { %v4323_v55 = vpop.f32.mrf.mxu1 }
0x149e   :  { %v3971_v55 = vld [vmem:[%s5254_s5 + $0x18] sm:$0xf] }
0x149f   :  { %v2798_v56 = vpop.f32.mrf.mxu0 }
0x14a0   :  { %v2802_v57 = vpack.c.bf16 %v2798_v56, %v2722_v54  ;;  %v3232_v56 = vsel %vm968_vm3, %v3971_v55, 0 }
0x14a1   :  { %v4328_v58 = vpop.f32.mrf.mxu0 }
0x14a2   :  { %4332 = vmatmul.mubr.msk.bf16.vlgmr.msra.gmra.mxu1 %vm307_vm2, %v2802_v57 }
0x14a3   :  { %4342 = vmatpush3.xpose.msk.msra.mxu1 %vm307_vm2, %v2900_v59  ;;  %v5107_v60 = vpop.f32.mrf.mxu0  ;;  %4343 = vmatprep.mubr.msk.f32.mxu1 %vm4564_vm0, %v4563_v23 }
0x14a4   :  { %4351 = vmatprep.subr.mxu1 %v4563_v23 }
0x14a5   :  { %v4339_v61 = vpop.f32.mrf.mxu0 }
0x14a7   :  { %v5112_v62 = vpop.f32.mrf.mxu0 }
0x14a9   :  { %v4340_v0 = vpop.f32.mrf.mxu0 }
0x14aa   :  { %4344 = vmatmul.mubr.msk.f32.vlgmr.msra.gmra.mxu1 %vm307_vm2, %v2898_v63 }
0x14ab   :  { %v3049_v1 = vpop.f32.mrf.mxu0  ;;  %4353 = vmatprep.mubr.msk.f32.mxu1 %vm4564_vm0, %v4563_v23 }
0x14ac   :  { %v3056_v3 = vsel %vm307_vm2, %v3049_v1, -inf }
0x14ad   :  { %3057 = vmax.xlane.f32.xlu0 %v3056_v3  ;;  %v4350_v5 = vpop.f32.mrf.mxu0 }
0x14c3   :  { %3151 = vrot.lane.b32.xlu0 %v5011_v33, %s4573_s25 }
0x14c7   :  { %3277 = vrot.lane.b32.xlu0 %v5007_v4, %s4574_s26 }
0x14cb   :  { %3355 = vrot.lane.b32.xlu0 %v5011_v33, %s4574_s26 }
0x1536   :  { %v3058_v6 = vpop.xlane.xlu0 %3057 }
0x1537   :  { %v3060_v8 = vsub.f32 %v3049_v1, %v3058_v6 }
0x1539   :  { %v3063_v9 = vmul.f32 1.442695, %v3060_v8 }
0x153a   :  { %v3152_v10 = vpop.permute.xlu0 %3151 }
0x153b   :  { %4517 = vpow2.f32 %v3063_v9  ;;  %4357 = vmatpush3.msra.mxu0 %v3152_v10 }
0x153c   :  { %4367 = vmatprep.subr.mxu0 %v4563_v23 }
0x153e   :  { %v3278_v16 = vpop.permute.xlu0 %3277 }
0x1542   :  { %v3356_v32 = vpop.permute.xlu0 %3355 }
0x1548   :  { %v4518_v11 = vpop.eup %4517 }
0x1549   :  { %v3068_v13 = vsel %vm307_vm2, %v4518_v11, 0.0 }
0x154a   :  { %3069 = vadd.xlane.f32.xlu1 %v3068_v13 }
0x155b   :  { %3357 = vrot.lane.b32.xlu1 %v5011_v33, %s4572_s20 }
0x1562   :  { %v5128_v14 = vpop.f32.mrf.mxu1 }
0x1564   :  { %v4333_v15 = vpop.f32.mrf.mxu1 }
0x1566   :  { %v5130_v17 = vpop.f32.mrf.mxu1 }
0x1568   :  { %v4334_v20 = vpop.f32.mrf.mxu1 }
0x156a   :  { %v2971_v21 = vpop.f32.mrf.mxu1 }
0x156b   :  { %v3053_v24 = vsel %vm307_vm2, %v2971_v21, -inf }
0x156c   :  { %v4345_v22 = vpop.f32.mrf.mxu1 }
0x157f   :  { %3054 = vmax.xlane.f32.xlu1 %v3053_v24  ;;  %v3972_v24 = vld [vmem:[%s5254_s5 + $0x1c] sm:$0xf] }
0x15d3   :  { %v3070_v26 = vpop.xlane.xlu1 %3069 }
0x15d4   :  { %4519 = vrcp.f32 %v3070_v26  ;;  %v2891_v26 = vadd.f32 %v5107_v60, %v5128_v14  ;;  %v3660_v60 = vrot.slane %v5002_v31, %v1822_v2 }
0x15d7   :  { %v3358_v18 = vpop.permute.xlu1 %3357 }
0x15e1   :  { %v4520_v30 = vpop.eup %4519 }
0x15e2   :  { %v3074_v43 = vmul.f32 %v4520_v30, %v4518_v11 }
0x15e4   :  { %4359 = vmatmul.mubr.msk.f32.vlgmr.msra.gmra.mxu0 %vm307_vm2, %v3074_v43 }
0x15e5   :  { %4368 = vmatpush3.xpose.msk.msra.mxu0 %vm307_vm2, %v3280_v25  ;;  %4369 = vmatprep.mubr.msk.f32.mxu0 %vm4564_vm0, %v4563_v23  ;;  %v3612_v25 = vsel %vm968_vm3, %v3972_v24, 0 }
0x15e6   :  { %4372 = vmatprep.subr.mxu0 %v4563_v23 }
0x15e8   :  { %4370 = vmatmul.mubr.msk.f32.vlgmr.msra.gmra.mxu0 %vm307_vm2, %v3278_v16 }
0x15e9   :  { %4373 = vmatpush3.xpose.msk.msra.mxu0 %vm307_vm2, %v3358_v18  ;;  %4374 = vmatprep.mubr.msk.f32.mxu0 %vm4564_vm0, %v4563_v23  ;;  %v2894_v18 = vadd.f32 %v5112_v62, %v5130_v17 }
0x15ea   :  { %4382 = vmatprep.subr.mxu0 %v4563_v23 }
0x15ec   :  { %4375 = vmatmul.mubr.msk.f32.vlgmr.msra.gmra.mxu0 %vm307_vm2, %v3356_v32 }
0x15ed   :  { %4384 = vmatprep.mubr.msk.f32.mxu0 %vm4564_vm0, %v4563_v23 }
0x1608   :  { %v3055_v34 = vpop.xlane.xlu1 %3054 }
0x1609   :  { %v3059_v36 = vsub.f32 %v2971_v21, %v3055_v34 }
0x160b   :  { %v3061_v42 = vmul.f32 1.442695, %v3059_v36 }
0x160d   :  { %4521 = vpow2.f32 %v3061_v42 }
0x161a   :  { %v4522_v39 = vpop.eup %4521 }
0x161b   :  { %v3065_v40 = vsel %vm307_vm2, %v4522_v39, 0.0 }
0x161c   :  { %3066 = vadd.xlane.f32.xlu0 %v3065_v40 }
0x1632   :  { %3075 = vrot.lane.b32.xlu0 %v5007_v4, %s4573_s25 }
0x1636   :  { %3531 = vrot.lane.b32.xlu0 %v5011_v33, %s4575_s27 }
0x16a4   :  { %v3223_v44 = vpop.f32.mrf.mxu0 }
0x16a5   :  { %v3067_v45 = vpop.xlane.xlu0 %3066 }
0x16a6   :  { %4523 = vrcp.f32 %v3067_v45  ;;  %v4360_v47 = vpop.f32.mrf.mxu0 }
0x16a8   :  { %v3351_v48 = vpop.f32.mrf.mxu0 }
0x16a9   :  { %v3076_v50 = vpop.permute.xlu0 %3075  ;;  %v3433_v51 = vsel %vm307_vm2, %v3351_v48, -inf }
0x16aa   :  { %v4371_v52 = vpop.f32.mrf.mxu0  ;;  %3434 = vmax.xlane.f32.xlu1 %v3433_v51  ;;  %4352 = vmatpush3.msra.mxu1 %v3076_v50 }
0x16ab   :  { %4361 = vmatprep.subr.bf16.mxu1 %v4563_v23 }
0x16ac   :  { %v3429_v37 = vpop.f32.mrf.mxu0 }
0x16ad   :  { %v3532_v49 = vpop.permute.xlu0 %3531  ;;  %v3436_v38 = vsel %vm307_vm2, %v3429_v37, -inf }
0x16ae   :  { %v4376_v53 = vpop.f32.mrf.mxu0  ;;  %3437 = vmax.xlane.f32.xlu1 %v3436_v38  ;;  %4383 = vmatpush3.msra.mxu0 %v3532_v49 }
0x16af   :  { %4393 = vmatprep.subr.bf16.mxu0 %v4563_v23 }
0x16b3   :  { %v4524_v33 = vpop.eup %4523 }
0x16b4   :  { %v3073_v54 = vmul.f32 %v4524_v33, %v4522_v39 }
0x16b6   :  { %4354 = vmatmul.mubr.msk.f32.vlgmr.msra.gmra.mxu1 %vm307_vm2, %v3073_v54 }
0x16b7   :  { %4363 = vmatprep.mubr.msk.bf16.mxu1 %vm4564_vm0, %v4563_v23  ;;  %4362 = vmatpush3.bf16.msra.mxu1 %v3232_v56  ;;  %v4456_v56 = vld [vmem:[%s5255_s6 + $0x10] sm:$0xff]  }
0x16b8   :  { %4377 = vmatprep.subr.mxu1 %v4563_v23 }
0x1733   :  { %v3435_v57 = vpop.xlane.xlu1 %3434 }
0x1734   :  { %v3439_v58 = vsub.f32 %v3351_v48, %v3435_v57 }
0x1736   :  { %v3441_v59 = vmul.f32 1.442695, %v3439_v58 }
0x1737   :  { %v3438_v61 = vpop.xlane.xlu1 %3437 }
0x1738   :  { %4525 = vpow2.f32 %v3441_v59  ;;  %v3440_v63 = vsub.f32 %v3429_v37, %v3438_v61 }
0x173a   :  { %v3443_v0 = vmul.f32 1.442695, %v3440_v63 }
0x173c   :  { %4527 = vpow2.f32 %v3443_v0 }
0x1745   :  { %v4526_v1 = vpop.eup %4525 }
0x1746   :  { %v3445_v3 = vsel %vm307_vm2, %v4526_v1, 0.0 }
0x1747   :  { %3446 = vadd.xlane.f32.xlu1 %v3445_v3 }
0x1749   :  { %v4528_v5 = vpop.eup %4527 }
0x174a   :  { %v3448_v6 = vsel %vm307_vm2, %v4528_v5, 0.0 }
0x174b   :  { %3449 = vadd.xlane.f32.xlu1 %v3448_v6 }
0x175c   :  { %3455 = vrot.lane.b32.xlu1 %v5007_v4, %s4575_s27 }
0x1776   :  { %v3147_v8 = vpop.f32.mrf.mxu1 }
0x1777   :  { %v3227_v9 = vpack.c.bf16 %v3223_v44, %v3147_v8 }
0x1778   :  { %v4355_v10 = vpop.f32.mrf.mxu1 }
0x1779   :  { %4364 = vmatmul.mubr.msk.bf16.vlgmr.msra.gmra.mxu1 %vm307_vm2, %v3227_v9 }
0x177a   :  { %4379 = vmatprep.mubr.msk.f32.mxu1 %vm4564_vm0, %v4563_v23 }
0x17d0   :  { %v3447_v11 = vpop.xlane.xlu1 %3446 }
0x17d1   :  { %4529 = vrcp.f32 %v3447_v11 }
0x17d4   :  { %v3450_v13 = vpop.xlane.xlu1 %3449 }
0x17d5   :  { %4531 = vrcp.f32 %v3450_v13 }
0x17d8   :  { %v3456_v15 = vpop.permute.xlu1 %3455 }
0x17d9   :  { %4378 = vmatpush3.msra.mxu1 %v3456_v15 }
0x17da   :  { %4387 = vmatprep.subr.bf16.mxu1 %v4563_v23 }
0x17de   :  { %v4530_v20 = vpop.eup %4529 }
0x17df   :  { %v3453_v21 = vmul.f32 %v4530_v20, %v4526_v1 }
0x17e1   :  { %4380 = vmatmul.mubr.msk.f32.vlgmr.msra.gmra.mxu1 %vm307_vm2, %v3453_v21 }
0x17e2   :  { %v4532_v4 = vpop.eup %4531  ;;  %4389 = vmatprep.mubr.msk.bf16.mxu1 %vm4564_vm0, %v4563_v23  ;;  %4388 = vmatpush3.bf16.msra.mxu1 %v3612_v25 }
0x17e3   :  { %v3454_v22 = vmul.f32 %v4532_v4, %v4528_v5  ;;  %4401 = vmatprep.subr.bf16.mxu1 %v4563_v23 }
0x17e5   :  { %4385 = vmatmul.mubr.msk.f32.vlgmr.msra.gmra.mxu0 %vm307_vm2, %v3454_v22  ;;  %v3700_v22 = vrot.slane %v5002_v31, %v1863_v7  ;;  %v4459_v7 = vld [vmem:[%s5256_s7 + $0x28] sm:$0xff]  }
0x17e6   :  { %4397 = vmatprep.mubr.msk.bf16.mxu0 %vm4564_vm0, %v4563_v23 }
0x1839   :  { %v3268_v30 = vpop.f32.mrf.mxu1 }
0x183a   :  { %v3275_v43 = vadd.f32 %v3268_v30, %v2891_v26 }
0x183b   :  { %v4365_v16 = vpop.f32.mrf.mxu1 }
0x183d   :  { %v3271_v32 = vpop.f32.mrf.mxu1 }
0x183e   :  { %v3276_v34 = vadd.f32 %v3271_v32, %v2894_v18 }
0x183f   :  { %v4366_v36 = vpop.f32.mrf.mxu1 }
0x1840   :  { %v4458_v36 = vld [vmem:[%s5256_s7 + $0x30] sm:$0xff]  }
0x18a1   :  { %v3527_v42 = vpop.f32.mrf.mxu1 }
0x18a3   :  { %v4381_v39 = vpop.f32.mrf.mxu1 }
0x18a5   :  { %v3603_v40 = vpop.f32.mrf.mxu0 }
0x18a6   :  { %v3607_v44 = vpack.c.bf16 %v3603_v40, %v3527_v42  ;;  %v3713_v42 = vrot.slane %v5002_v31, %v1876_v27 }
0x18a7   :  { %v4386_v45 = vpop.f32.mrf.mxu0 }
0x18a8   :  { %4390 = vmatmul.mubr.msk.bf16.vlgmr.msra.gmra.mxu1 %vm307_vm2, %v3607_v44 }
0x18a9   :  { %4409 = vmatprep.mubr.msk.bf16.mxu1 %vm4564_vm0, %v4563_v23 }
0x1968   :  { %v3648_v14 = vpop.f32.mrf.mxu1 }
0x1969   :  { %v3655_v47 = vadd.f32 %v3648_v14, %v3275_v43  ;;  %v3706_v43 = vrot.slane %v5002_v31, %v1869_v12  ;;  %v4460_v12 = vld [vmem:[%s5256_s7 + $0x20] sm:$0xff]  }
0x196a   :  { %v4391_v62 = vpop.f32.mrf.mxu1 }
0x196b   :  { %v3661_v17 = vadd.f32 %v3660_v60, %v3655_v47 }
0x196c   :  { %v3651_v48 = vpop.f32.mrf.mxu1 }
0x196d   :  { %v3663_v50 = vadd.f32 %v3661_v17, %v4990_v28  ;;  %v3656_v51 = vadd.f32 %v3651_v48, %v3276_v34  ;;  %v4455_v28 = vld [vmem:[%s5255_s6 + $0x18] sm:$0xff]  }
0x196e   :  { %v4392_v52 = vpop.f32.mrf.mxu1  ;;  %4394 = vmatpush3.bf16.msra.mxu0 %v4455_v28 }
0x196f   :  { %v3662_v37 = vadd.f32 %v3660_v60, %v3656_v51  ;;  %v3665_v49 = vsel %vm259_vm1, %v3663_v50, 0.0  ;;  %v3673_v38 = vmul.f32 %v3663_v50, %v3663_v50  ;;  %4395 = vmatprep.subr.bf16.mxu0 %v4563_v23 }
0x1970   :  { %3666 = vadd.xlane.f32.xlu0 %v3665_v49 }
0x1971   :  { %v3664_v53 = vadd.f32 %v3662_v37, %v4992_v29  ;;  %v3675_v33 = vsel %vm259_vm1, %v3673_v38, 0.0  ;;  %v4457_v29 = vld [vmem:[%s5256_s7 + $0x38] sm:$0xff]   ;;  %s4576_s7 = smov [#allocation2]  }
0x1972   :  { %4396 = vmatpush3.bf16.msra.mxu0 %v4456_v56  ;;  %4402 = vmatpush3.bf16.msra.mxu1 %v4457_v29  ;;  %s3898_s24 = sshll.u32 %s4576_s7, 4  ;;  %s3899_s24 = int_to_ptr.vmem [resolvable:$true] %s3898_s24 }
0x1973   :  { %v3668_v2 = vsel %vm259_vm1, %v3664_v53, 0.0  ;;  %v3674_v54 = vmul.f32 %v3664_v53, %v3664_v53  ;;  %4403 = vmatprep.subr.bf16.mxu1 %v4563_v23  ;;  %s4541_s28 = scalar_lea.vmem %s3899_s24, 256  ;;  %p4546_p1 = scmp.lt.s32.totalorder %s3899_s24, %s3899_s24 }
0x1974   :  { %3676 = vadd.xlane.f32.xlu0 %v3675_v33  ;;  %3669 = vadd.xlane.f32.xlu1 %v3668_v2  ;;  %p4542_p0 = scmp.ne.s32.totalorder %s3899_s24, %s4541_s28  ;;  %p4547_p2 = scmp.lt.s32.totalorder %s4541_s28, %s4541_s28 }
0x1975   :  { %v3678_v55 = vsel %vm259_vm1, %v3674_v54, 0.0 }
0x1976   :  { %4404 = vmatpush3.bf16.msra.mxu1 %v4458_v36  ;;  %p4548_p3 = por %p4547_p2, %p4546_p1 }
0x1977   :  { %4405 = vmatprep.subr.bf16.mxu1 %v4563_v23 }
0x1978   :  { %3679 = vadd.xlane.f32.xlu0 %v3678_v55  ;;  %p4549_p4 = pnand %p4548_p3, %p4542_p0 }
0x197a   :  { %4406 = vmatpush3.bf16.msra.mxu1 %v4459_v7 }
0x197b   :  { %4407 = vmatprep.subr.bf16.mxu1 %v4563_v23  ;;  %v3776_v23 = vrot.slane %v5002_v31, %v1939_v35 }
0x197e   :  { %4408 = vmatpush3.bf16.msra.mxu1 %v4460_v12 }
0x19f9   :  { %v3667_v57 = vpop.xlane.xlu0 %3666 }
0x19fa   :  { %v3671_v58 = vmul.f32 0.03125, %v3667_v57 }
0x19fc   :  { %v3683_v63 = vmul.f32 %v3671_v58, %v3671_v58  ;;  %v3689_v20 = vsub.f32 %v3663_v50, %v3671_v58 }
0x19fd   :  { %v3677_v59 = vpop.xlane.xlu0 %3676  ;;  %v3670_v61 = vpop.xlane.xlu1 %3669 }
0x19fe   :  { %v3681_v0 = vmul.f32 0.03125, %v3677_v59  ;;  %v3672_v1 = vmul.f32 0.03125, %v3670_v61 }
0x1a00   :  { %v3685_v3 = vsub.f32 %v3681_v0, %v3683_v63  ;;  %v3684_v8 = vmul.f32 %v3672_v1, %v3672_v1  ;;  %v3690_v24 = vsub.f32 %v3664_v53, %v3672_v1 }
0x1a01   :  { %v3680_v5 = vpop.xlane.xlu0 %3679 }
0x1a02   :  { %v3687_v6 = vmax.f32 %v3685_v3, 0.0  ;;  %v3682_v9 = vmul.f32 0.03125, %v3680_v5 }
0x1a04   :  { %v3691_v10 = vadd.f32 1e-05, %v3687_v6  ;;  %v3686_v11 = vsub.f32 %v3682_v9, %v3684_v8 }
0x1a06   :  { %4533 = vrsqrt.f32 %v3691_v10  ;;  %v3688_v13 = vmax.f32 %v3686_v11, 0.0 }
0x1a08   :  { %v3692_v15 = vadd.f32 1e-05, %v3688_v13  ;;  %v3882_v13 = vrot.slane %v5002_v31, %v2046_v46 }
0x1a0a   :  { %4535 = vrsqrt.f32 %v3692_v15 }
0x1a13   :  { %v4534_v21 = vpop.eup %4533 }
0x1a14   :  { %v3695_v4 = vmul.f32 %v4534_v21, %v3689_v20  ;;  %v3888_v21 = vrot.slane %v5002_v31, %v2052_v19 }
0x1a16   :  { %v3701_v30 = vmul.f32 %v3700_v22, %v3695_v4 }
0x1a17   :  { %v4536_v25 = vpop.eup %4535 }
0x1a18   :  { %v3696_v26 = vmul.f32 %v4536_v25, %v3690_v24  ;;  %v3707_v18 = vadd.f32 %v3706_v43, %v3701_v30 }
0x1a1a   :  { %v3702_v16 = vmul.f32 %v3700_v22, %v3696_v26 }
0x1a1c   :  { %v3708_v32 = vadd.f32 %v3706_v43, %v3702_v16 }
0x1a1e   :  { %v3709_v34 = vpack.c.bf16 %v3708_v32, %v3707_v18 }
0x1a20   :  { %4398 = vmatmul.mubr.msk.bf16.vlgmr.msra.gmra.mxu0 %vm259_vm1, %v3709_v34 }
0x1ae0   :  { %v3763_v39 = vpop.f32.mrf.mxu0 }
0x1ae1   :  { %v3764_v44 = vadd.f32 %v3763_v39, %v3713_v42 }
0x1ae2   :  { %v4399_v40 = vpop.f32.mrf.mxu0 }
0x1ae3   :  { %v3770_v47 = vmax.f32 %v3764_v44, 0.0 }
0x1ae4   :  { %v3766_v45 = vpop.f32.mrf.mxu0 }
0x1ae5   :  { %v3767_v60 = vadd.f32 %v3766_v45, %v3713_v42 }
0x1ae6   :  { %v4400_v14 = vpop.f32.mrf.mxu0 }
0x1ae7   :  { %v3771_v62 = vmax.f32 %v3767_v60, 0.0 }
0x1ae9   :  { %v3772_v17 = vpack.c.bf16 %v3771_v62, %v3770_v47 }
0x1aeb   :  { %4410 = vmatmul.mubr.msk.bf16.vlgmr.msra.gmra.mxu1 %vm1965_vm4, %v3772_v17 }
0x1bab   :  { %v3838_v48 = vpop.f32.mrf.mxu1 }
0x1bac   :  { %v3839_v50 = vadd.f32 %v3838_v48, %v3776_v23 }
0x1bad   :  { %v4411_v51 = vpop.f32.mrf.mxu1 }
0x1bae   :  { %v3845_v52 = vadd.f32 %v3839_v50, %v3707_v18 }
0x1baf   :  { %v3841_v27 = vpop.f32.mrf.mxu1 }
0x1bb0   :  { %v3842_v37 = vadd.f32 %v3841_v27, %v3776_v23  ;;  %v3847_v49 = vsel %vm259_vm1, %v3845_v52, 0.0  ;;  %v3855_v38 = vmul.f32 %v3845_v52, %v3845_v52 }
0x1bb1   :  { %3848 = vadd.xlane.f32.xlu0 %v3847_v49  ;;  %v4412_v53 = vpop.f32.mrf.mxu1 }
0x1bb2   :  { %v3846_v33 = vadd.f32 %v3842_v37, %v3708_v32  ;;  %v3857_v2 = vsel %vm259_vm1, %v3855_v38, 0.0 }
0x1bb3   :  { %3858 = vadd.xlane.f32.xlu1 %v3857_v2 }
0x1bb4   :  { %v3850_v54 = vsel %vm259_vm1, %v3846_v33, 0.0  ;;  %v3856_v55 = vmul.f32 %v3846_v33, %v3846_v33 }
0x1bb5   :  { %3851 = vadd.xlane.f32.xlu0 %v3850_v54 }
0x1bb6   :  { %v3860_v35 = vsel %vm259_vm1, %v3856_v55, 0.0 }
0x1bb9   :  { %3861 = vadd.xlane.f32.xlu0 %v3860_v35 }
0x1c3a   :  { %v3849_v28 = vpop.xlane.xlu0 %3848 }
0x1c3b   :  { %v3853_v56 = vmul.f32 0.03125, %v3849_v28 }
0x1c3c   :  { %v3859_v29 = vpop.xlane.xlu1 %3858 }
0x1c3d   :  { %v3865_v57 = vmul.f32 %v3853_v56, %v3853_v56  ;;  %v3863_v58 = vmul.f32 0.03125, %v3859_v29  ;;  %v3871_v11 = vsub.f32 %v3845_v52, %v3853_v56 }
0x1c3e   :  { %v3852_v59 = vpop.xlane.xlu0 %3851 }
0x1c3f   :  { %v3867_v61 = vsub.f32 %v3863_v58, %v3865_v57  ;;  %v3854_v63 = vmul.f32 0.03125, %v3852_v59 }
0x1c41   :  { %v3869_v0 = vmax.f32 %v3867_v61, 0.0  ;;  %v3866_v5 = vmul.f32 %v3854_v63, %v3854_v63  ;;  %v3872_v22 = vsub.f32 %v3846_v33, %v3854_v63 }
0x1c42   :  { %v3862_v1 = vpop.xlane.xlu0 %3861 }
0x1c43   :  { %v3873_v3 = vadd.f32 1e-05, %v3869_v0  ;;  %v3864_v6 = vmul.f32 0.03125, %v3862_v1 }
0x1c45   :  { %4537 = vrsqrt.f32 %v3873_v3  ;;  %v3868_v8 = vsub.f32 %v3864_v6, %v3866_v5 }
0x1c47   :  { %v3870_v9 = vmax.f32 %v3868_v8, 0.0 }
0x1c49   :  { %v3874_v10 = vadd.f32 1e-05, %v3870_v9 }
0x1c4b   :  { %4539 = vrsqrt.f32 %v3874_v10 }
0x1c52   :  { %v4538_v15 = vpop.eup %4537 }
0x1c53   :  { %v3877_v20 = vmul.f32 %v4538_v15, %v3871_v11 }
0x1c55   :  { %v3883_v4 = vmul.f32 %v3882_v13, %v3877_v20 }
0x1c57   :  { %v3889_v24 = vadd.f32 %v3888_v21, %v3883_v4 }
0x1c58   :  { %v4540_v25 = vpop.eup %4539 }
0x1c59   :  { %v3878_v26 = vmul.f32 %v4540_v25, %v3872_v22  ;;  %3891 = vst.msk [vmem:[#allocation2] sm:$0xff] %vm259_vm1, %v3889_v24 }
0x1c5b   :  { %v3884_v30 = vmul.f32 %v3882_v13, %v3878_v26 }
0x1c5d   :  { %v3890_v43 = vadd.f32 %v3888_v21, %v3884_v30 }
0x1c5f   :  { %3892 = vst.msk [vmem:[#allocation2 + $0x8] sm:$0xff] %vm259_vm1, %v3890_v43 }
0x1c60   :  { %4552 = shalt.err (!%p4549_p4)
}
0x1c61   :  { %s4577_s29 = smov 128   ;;  %s4578_s1 = smov 8  }
0x1c62   :  { %3904 = dma.vmem_to_hbm [thread:$0]  %s3899_s24, 256, %s5258_s9, [#allocation3], %s4577_s29, %s4577_s29, %s4578_s1  }
0x1c63   :  { %4561 = dma.done.wait [#allocation3], 256  }
0x1c64   :  { %4562 = vsyncadd [#allocation3], 4294967040 }
0x1c65   :  { %3908 = vsyncpa [#allocation3], 1 }

</bundles_post_ra>
